<compile_context>
chip_gen: v5e
topology: v5e:2x2
jax: 0.10.0
libtpu: 0.0.40
codegen_flags: <defaults>
</compile_context>

<pallas_src>
import jax
import jax.numpy as jnp
from jax import lax
from jax.experimental import pallas as pl
from jax.experimental.pallas import tpu as pltpu

VOCAB_SIZE = 1590         # module default
EMBEDDING_DIM = 128       # required by the hard-coded conv stack
BASE_CC = 32
MAX_LEN = 32              # hard-coded max_sentence_length
NEG_SLOPE = 0.2


def _lrelu(y):
    return jnp.where(y > 0, y, NEG_SLOPE * y)


def _conv_s2_k4_p1(src_ref, w_ref, b_ref, lo):
    """Conv1d(kernel=4, stride=2, pad=1) + LeakyReLU on a batch-folded tile.

    src_ref : (TB*L, C) f32 ref, row m = b*L + t with L = 2*lo positions/example.
    w_ref   : (4*C, C_out) bf16, rows tap-major (j*C + ci); tap j reads padded
              position 2l+j, i.e. original position 2l+j-1.
    b_ref   : (1, C_out) f32.
    returns : (TB*lo, C_out) f32, row m' = b*lo + l.
    """
    rows, _ = src_ref.shape
    n = rows // 2                                    # = TB * lo output rows
    # Strided sublane loads give taps j=1 (x[b,2l]) and j=2 (x[b,2l+1])
    # directly; example boundaries line up because L is even.
    even = src_ref[pl.ds(0, n, stride=2), :]         # tap j=1
    odd = src_ref[pl.ds(1, n, stride=2), :]          # tap j=2
    # Per-example position index l = m' mod lo (lo is a power of two).
    l_idx = lax.broadcasted_iota(jnp.int32, (n, 1), 0) & (lo - 1)
    # tap j=0 -> x[b, 2l-1]: odd rows shifted down by one, pad row at l == 0.
    tap0 = jnp.where(l_idx == 0, 0.0, pltpu.roll(odd, 1, axis=0))
    # tap j=3 -> x[b, 2l+2]: even rows shifted up by one, pad row at l == lo-1.
    tap3 = jnp.where(l_idx == lo - 1, 0.0, pltpu.roll(even, n - 1, axis=0))
    cols = jnp.concatenate([tap0, even, odd, tap3], axis=1)      # (n, 4*C)
    y = jnp.dot(cols.astype(w_ref.dtype), w_ref[...],
                preferred_element_type=jnp.float32) + b_ref[...]
    return _lrelu(y)


def feature_kernel(x_ref, w1, b1, w2, b2, w3, b3, w4, b4, w5, b5,
                   o_ref, s0, s1, s2):
    # x_ref: (TB*32, 128) bf16 embedded tokens, batch folded onto rows.
    # Upcast once into f32 scratch so all strided tap gathers run on an
    # unpacked-layout ref (proven lowering path); bf16->f32->bf16 is lossless
    # so matmul operands are identical to the all-f32 variant.
    s0[...] = x_ref[...].astype(jnp.float32)                      # (TB*32, 128)
    s1[...] = _conv_s2_k4_p1(s0, w1, b1, 16)                      # (TB*16, 32)
    s2[...] = _conv_s2_k4_p1(s1, w2, b2, 8)                       # (TB*8, 64)
    h = _conv_s2_k4_p1(s2, w3, b3, 4)                             # (TB*4, 128)
    h = _lrelu(jnp.dot(h.astype(w4.dtype), w4[...],
                       preferred_element_type=jnp.float32) + b4[...])  # (TB*4, 256)
    h = _lrelu(jnp.dot(h.astype(w5.dtype), w5[...],
                       preferred_element_type=jnp.float32) + b5[...])  # (TB*4, 512)
    o_ref[...] = h


def cub_sent_feature_map(token_ids, params, tb=32):
    """tb = examples per grid step (even; <=128 keeps VMEM safe on all chips).

    tb=32 gives matmul M dims of 512/256/128 and ~3.5 MiB VMEM per step;
    tb=64 is also safe everywhere and further amortizes per-step overhead.
    """
    tb = int(tb)
    assert tb >= 2 and tb % 2 == 0, "tb must be an even positive integer"
    B = token_ids.shape[0]
    Bp = ((B + tb - 1) // tb) * tb

    # Embedding gather stays in XLA (see TODO above).  The table is cast to
    # bf16 before the gather: the kernel rounds first-layer matmul operands to
    # bf16 anyway, so this is numerically identical while halving the HBM
    # bytes of the kernel's dominant input stream.  Pad batch to a multiple of
    # tb and fold (batch, position) onto a single row axis.
    emb_bf16 = params["embedding"].astype(jnp.bfloat16)
    xe = jnp.take(emb_bf16, token_ids, axis=0)                    # (B, 32, 128) bf16
    if Bp != B:
        xe = jnp.pad(xe, ((0, Bp - B), (0, 0), (0, 0)))
    x2d = xe.reshape(Bp * MAX_LEN, EMBEDDING_DIM)                 # (Bp*32, 128)

    # Conv weights (C_out, C_in, k) -> (k*C_in, C_out) bf16 (done once here);
    # biases -> (1, C_out) f32.  Constant index_maps keep them VMEM-resident.
    w_args = []
    in_specs = [pl.BlockSpec((tb * MAX_LEN, EMBEDDING_DIM), lambda i: (i, 0))]
    for li in range(1, 6):
        w = params[f"w{li}"]
        co, ci, k = w.shape
        w2d = jnp.transpose(w, (2, 1, 0)).reshape(k * ci, co).astype(jnp.bfloat16)
        b2d = params[f"b{li}"].reshape(1, co).astype(jnp.float32)
        w_args += [w2d, b2d]
        in_specs += [pl.BlockSpec(w2d.shape, lambda i: (0, 0)),
                     pl.BlockSpec(b2d.shape, lambda i: (0, 0))]

    c_last = BASE_CC * 16                                          # 512
    out = pl.pallas_call(
        feature_kernel,
        out_shape=jax.ShapeDtypeStruct((Bp * 4, c_last), jnp.float32),
        grid_spec=pltpu.PrefetchScalarGridSpec(
            num_scalar_prefetch=0,
            grid=(Bp // tb,),
            in_specs=in_specs,
            out_specs=pl.BlockSpec((tb * 4, c_last), lambda i: (i, 0)),
            scratch_shapes=[pltpu.VMEM((tb * MAX_LEN, EMBEDDING_DIM), jnp.float32),
                            pltpu.VMEM((tb * 16, BASE_CC), jnp.float32),
                            pltpu.VMEM((tb * 8, BASE_CC * 2), jnp.float32)],
        ),
        compiler_params=pltpu.CompilerParams(
            dimension_semantics=("parallel",)),
    )(x2d, *w_args)

    out = out.reshape(Bp, 4, c_last)[:B]
    # Match torch .view(B, -1) applied to the NCL tensor (B, 512, 4).
    return jnp.transpose(out, (0, 2, 1)).reshape(B, -1)


def reference(token_ids, params):
    """Pure-JAX f32 reference using lax.conv_general_dilated (NCL, like PyTorch)."""
    xe = jnp.take(params["embedding"], token_ids, axis=0).astype(jnp.float32)
    x = jnp.transpose(xe, (0, 2, 1))                               # (B, 128, 32)

    def conv(x, w, b, stride, pad):
        y = lax.conv_general_dilated(x, w, (stride,), [(pad, pad)],
                                     dimension_numbers=("NCH", "OIH", "NCH"))
        return y + b.reshape(1, -1, 1)

    x = _lrelu(conv(x, params["w1"], params["b1"], 2, 1))
    x = _lrelu(conv(x, params["w2"], params["b2"], 2, 1))
    x = _lrelu(conv(x, params["w3"], params["b3"], 2, 1))
    x = _lrelu(conv(x, params["w4"], params["b4"], 1, 0))
    x = _lrelu(conv(x, params["w5"], params["b5"], 1, 0))
    return x.reshape(x.shape[0], -1)


def init_params(key):
    keys = jax.random.split(key, 11)
    emb = 0.1 * jax.random.normal(keys[0], (VOCAB_SIZE, EMBEDDING_DIM), jnp.float32)
    emb = emb.at[1].set(0.0)                                       # padding_idx=1
    layer_shapes = [
        (BASE_CC, EMBEDDING_DIM, 4),
        (BASE_CC * 2, BASE_CC, 4),
        (BASE_CC * 4, BASE_CC * 2, 4),
        (BASE_CC * 8, BASE_CC * 4, 1),
        (BASE_CC * 16, BASE_CC * 8, 1),
    ]
    params = {"embedding": emb}
    for i, (co, ci, k) in enumerate(layer_shapes, start=1):
        bound = 1.0 / (ci * k) ** 0.5
        params[f"w{i}"] = jax.random.uniform(
            keys[2 * i - 1], (co, ci, k), jnp.float32, -bound, bound)
        params[f"b{i}"] = jax.random.uniform(
            keys[2 * i], (co,), jnp.float32, -bound, bound)
    return params


if __name__ == "__main__":
    key = jax.random.PRNGKey(0)
    kp, kx = jax.random.split(key)
    params = init_params(kp)

    B = 10
    token_ids = jax.random.randint(kx, (B, MAX_LEN), 0, VOCAB_SIZE, dtype=jnp.int32)

    # tb=4 at this small batch exercises padding (10 -> 12) and a 3-step grid;
    # production callers should keep the default tb=32 (or 64 on v6e/v7x).
    out = cub_sent_feature_map(token_ids, params, tb=4)
    out = jax.block_until_ready(out)

    assert out.shape == (B, BASE_CC * 16 * 4), out.shape
    ref = reference(token_ids, params)
    max_err = float(jnp.max(jnp.abs(out - ref)))
    # bf16 matmul operands (f32 accumulation) -> loosened tolerance.
    assert jnp.allclose(out, ref, rtol=3e-2, atol=3e-3), max_err
    print("KERNEL_OK")
</pallas_src>

<mosaic_0001>
module attributes {stable_mosaic.version = 11 : i64} {
  func.func @feature_kernel(%arg0: i32, %arg1: memref<128x128xbf16, #tpu.memory_space<vmem>>, %arg2: memref<512x32xbf16, #tpu.memory_space<vmem>>, %arg3: memref<1x32xf32, #tpu.memory_space<vmem>>, %arg4: memref<128x64xbf16, #tpu.memory_space<vmem>>, %arg5: memref<1x64xf32, #tpu.memory_space<vmem>>, %arg6: memref<256x128xbf16, #tpu.memory_space<vmem>>, %arg7: memref<1x128xf32, #tpu.memory_space<vmem>>, %arg8: memref<128x256xbf16, #tpu.memory_space<vmem>>, %arg9: memref<1x256xf32, #tpu.memory_space<vmem>>, %arg10: memref<256x512xbf16, #tpu.memory_space<vmem>>, %arg11: memref<1x512xf32, #tpu.memory_space<vmem>>, %arg12: memref<16x512xf32, #tpu.memory_space<vmem>>, %arg13: memref<128x128xf32, #tpu.memory_space<vmem>>, %arg14: memref<64x32xf32, #tpu.memory_space<vmem>>, %arg15: memref<32x64xf32, #tpu.memory_space<vmem>>) attributes {dimension_semantics = [#tpu.dimension_semantics<parallel>], iteration_bounds = array<i64: 3>, scalar_prefetch = 0 : i64, scratch_operands = 3 : i64, tpu.core_type = #tpu.core_type<tc>, window_params = [{transform_indices = @transform_0, window_bounds = array<i64: 128, 128>}, {pipeline_mode = #tpu.pipeline_mode<synchronous>, transform_indices = @transform_1, window_bounds = array<i64: 512, 32>}, {pipeline_mode = #tpu.pipeline_mode<synchronous>, transform_indices = @transform_2, window_bounds = array<i64: 1, 32>}, {pipeline_mode = #tpu.pipeline_mode<synchronous>, transform_indices = @transform_3, window_bounds = array<i64: 128, 64>}, {pipeline_mode = #tpu.pipeline_mode<synchronous>, transform_indices = @transform_4, window_bounds = array<i64: 1, 64>}, {pipeline_mode = #tpu.pipeline_mode<synchronous>, transform_indices = @transform_5, window_bounds = array<i64: 256, 128>}, {pipeline_mode = #tpu.pipeline_mode<synchronous>, transform_indices = @transform_6, window_bounds = array<i64: 1, 128>}, {pipeline_mode = #tpu.pipeline_mode<synchronous>, transform_indices = @transform_7, window_bounds = array<i64: 128, 256>}, {pipeline_mode = #tpu.pipeline_mode<synchronous>, transform_indices = @transform_8, window_bounds = array<i64: 1, 256>}, {pipeline_mode = #tpu.pipeline_mode<synchronous>, transform_indices = @transform_9, window_bounds = array<i64: 256, 512>}, {pipeline_mode = #tpu.pipeline_mode<synchronous>, transform_indices = @transform_10, window_bounds = array<i64: 1, 512>}, {transform_indices = @transform_11, window_bounds = array<i64: 16, 512>}]} {
    %c0 = arith.constant 0 : index
    %c0_0 = arith.constant 0 : index
    %0 = vector.load %arg1[%c0, %c0_0] : memref<128x128xbf16, #tpu.memory_space<vmem>>, vector<128x128xbf16>
    %1 = arith.extf %0 : vector<128x128xbf16> to vector<128x128xf32>
    %c0_1 = arith.constant 0 : index
    %c0_2 = arith.constant 0 : index
    %2 = vector.load %arg13[%c0_1, %c0_2] : memref<128x128xf32, #tpu.memory_space<vmem>>, vector<128x128xf32>
    tpu.vector_store %arg13[%c0_1, %c0_2], %1 {strides = array<i32>} : memref<128x128xf32, #tpu.memory_space<vmem>>, vector<128x128xf32>,
    %c0_3 = arith.constant 0 : index
    %c0_4 = arith.constant 0 : index
    %3 = tpu.strided_load %arg13[%c0_3, %c0_4] {strides = array<i32: 2, 1>} : memref<128x128xf32, #tpu.memory_space<vmem>>, vector<64x128xf32>
    %c1 = arith.constant 1 : index
    %c0_5 = arith.constant 0 : index
    %4 = tpu.strided_load %arg13[%c1, %c0_5] {strides = array<i32: 2, 1>} : memref<128x128xf32, #tpu.memory_space<vmem>>, vector<64x128xf32>
    %5 = tpu.iota {dimensions = array<i32: 0>} : vector<64x1xi32>
    %c15_i32 = arith.constant 15 : i32
    %6 = vector.broadcast %c15_i32 : i32 to vector<64x1xi32>
    %7 = arith.andi %5, %6 : vector<64x1xi32>
    %c0_i32 = arith.constant 0 : i32
    %8 = vector.broadcast %c0_i32 : i32 to vector<64x1xi32>
    %9 = arith.cmpi eq, %7, %8 : vector<64x1xi32>
    %c1_i32 = arith.constant 1 : i32
    %10 = tpu.dynamic_rotate %4 by %c1_i32 dim 0 : vector<64x128xf32>, i32 -> vector<64x128xf32>
    %cst = arith.constant 0.000000e+00 : f32
    %11 = vector.shape_cast %9 : vector<64x1xi1> to vector<64x1xi1>
    %12 = vector.broadcast %11 : vector<64x1xi1> to vector<64x128xi1>
    %13 = vector.broadcast %cst : f32 to vector<64x128xf32>
    %14 = arith.select %12, %13, %10 : vector<64x128xi1>, vector<64x128xf32>
    %c15_i32_6 = arith.constant 15 : i32
    %15 = vector.broadcast %c15_i32_6 : i32 to vector<64x1xi32>
    %16 = arith.cmpi eq, %7, %15 : vector<64x1xi32>
    %c63_i32 = arith.constant 63 : i32
    %17 = tpu.dynamic_rotate %3 by %c63_i32 dim 0 : vector<64x128xf32>, i32 -> vector<64x128xf32>
    %cst_7 = arith.constant 0.000000e+00 : f32
    %18 = vector.shape_cast %16 : vector<64x1xi1> to vector<64x1xi1>
    %19 = vector.broadcast %18 : vector<64x1xi1> to vector<64x128xi1>
    %20 = vector.broadcast %cst_7 : f32 to vector<64x128xf32>
    %21 = arith.select %19, %20, %17 : vector<64x128xi1>, vector<64x128xf32>
    %22 = tpu.concatenate %14, %3, %4, %21 in 1 : vector<64x128xf32>, vector<64x128xf32>, vector<64x128xf32>, vector<64x128xf32> -> vector<64x512xf32>
    %23 = arith.truncf %22 : vector<64x512xf32> to vector<64x512xbf16>
    %c0_8 = arith.constant 0 : index
    %c0_9 = arith.constant 0 : index
    %24 = vector.load %arg2[%c0_8, %c0_9] : memref<512x32xbf16, #tpu.memory_space<vmem>>, vector<512x32xbf16>
    %cst_10 = arith.constant dense<0.000000e+00> : vector<64x32xf32>
    %25 = tpu.matmul %23, %24, %cst_10 {dimension_numbers = #tpu.dot_dimension_numbers<[1], [0], [0], [1], [0, 0, 1, 1], [], []>} : vector<64x512xbf16>, vector<512x32xbf16>, vector<64x32xf32> -> vector<64x32xf32>
    %c0_11 = arith.constant 0 : index
    %c0_12 = arith.constant 0 : index
    %26 = vector.load %arg3[%c0_11, %c0_12] : memref<1x32xf32, #tpu.memory_space<vmem>>, vector<1x32xf32>
    %27 = vector.broadcast %26 : vector<1x32xf32> to vector<64x32xf32>
    %28 = arith.addf %25, %27 : vector<64x32xf32>
    %cst_13 = arith.constant 0.000000e+00 : f32
    %29 = vector.broadcast %cst_13 : f32 to vector<64x32xf32>
    %30 = arith.cmpf ogt, %28, %29 : vector<64x32xf32>
    %cst_14 = arith.constant 2.000000e-01 : f32
    %31 = vector.broadcast %cst_14 : f32 to vector<64x32xf32>
    %32 = arith.mulf %31, %28 : vector<64x32xf32>
    %33 = arith.select %30, %28, %32 : vector<64x32xi1>, vector<64x32xf32>
    %c0_15 = arith.constant 0 : index
    %c0_16 = arith.constant 0 : index
    %34 = vector.load %arg14[%c0_15, %c0_16] : memref<64x32xf32, #tpu.memory_space<vmem>>, vector<64x32xf32>
    tpu.vector_store %arg14[%c0_15, %c0_16], %33 {strides = array<i32>} : memref<64x32xf32, #tpu.memory_space<vmem>>, vector<64x32xf32>,
    %c0_17 = arith.constant 0 : index
    %c0_18 = arith.constant 0 : index
    %35 = tpu.strided_load %arg14[%c0_17, %c0_18] {strides = array<i32: 2, 1>} : memref<64x32xf32, #tpu.memory_space<vmem>>, vector<32x32xf32>
    %c1_19 = arith.constant 1 : index
    %c0_20 = arith.constant 0 : index
    %36 = tpu.strided_load %arg14[%c1_19, %c0_20] {strides = array<i32: 2, 1>} : memref<64x32xf32, #tpu.memory_space<vmem>>, vector<32x32xf32>
    %37 = tpu.iota {dimensions = array<i32: 0>} : vector<32x1xi32>
    %c7_i32 = arith.constant 7 : i32
    %38 = vector.broadcast %c7_i32 : i32 to vector<32x1xi32>
    %39 = arith.andi %37, %38 : vector<32x1xi32>
    %c0_i32_21 = arith.constant 0 : i32
    %40 = vector.broadcast %c0_i32_21 : i32 to vector<32x1xi32>
    %41 = arith.cmpi eq, %39, %40 : vector<32x1xi32>
    %c1_i32_22 = arith.constant 1 : i32
    %42 = tpu.dynamic_rotate %36 by %c1_i32_22 dim 0 : vector<32x32xf32>, i32 -> vector<32x32xf32>
    %cst_23 = arith.constant 0.000000e+00 : f32
    %43 = vector.shape_cast %41 : vector<32x1xi1> to vector<32x1xi1>
    %44 = vector.broadcast %43 : vector<32x1xi1> to vector<32x32xi1>
    %45 = vector.broadcast %cst_23 : f32 to vector<32x32xf32>
    %46 = arith.select %44, %45, %42 : vector<32x32xi1>, vector<32x32xf32>
    %c7_i32_24 = arith.constant 7 : i32
    %47 = vector.broadcast %c7_i32_24 : i32 to vector<32x1xi32>
    %48 = arith.cmpi eq, %39, %47 : vector<32x1xi32>
    %c31_i32 = arith.constant 31 : i32
    %49 = tpu.dynamic_rotate %35 by %c31_i32 dim 0 : vector<32x32xf32>, i32 -> vector<32x32xf32>
    %cst_25 = arith.constant 0.000000e+00 : f32
    %50 = vector.shape_cast %48 : vector<32x1xi1> to vector<32x1xi1>
    %51 = vector.broadcast %50 : vector<32x1xi1> to vector<32x32xi1>
    %52 = vector.broadcast %cst_25 : f32 to vector<32x32xf32>
    %53 = arith.select %51, %52, %49 : vector<32x32xi1>, vector<32x32xf32>
    %54 = tpu.concatenate %46, %35, %36, %53 in 1 : vector<32x32xf32>, vector<32x32xf32>, vector<32x32xf32>, vector<32x32xf32> -> vector<32x128xf32>
    %55 = arith.truncf %54 : vector<32x128xf32> to vector<32x128xbf16>
    %c0_26 = arith.constant 0 : index
    %c0_27 = arith.constant 0 : index
    %56 = vector.load %arg4[%c0_26, %c0_27] : memref<128x64xbf16, #tpu.memory_space<vmem>>, vector<128x64xbf16>
    %cst_28 = arith.constant dense<0.000000e+00> : vector<32x64xf32>
    %57 = tpu.matmul %55, %56, %cst_28 {dimension_numbers = #tpu.dot_dimension_numbers<[1], [0], [0], [1], [0, 0, 1, 1], [], []>} : vector<32x128xbf16>, vector<128x64xbf16>, vector<32x64xf32> -> vector<32x64xf32>
    %c0_29 = arith.constant 0 : index
    %c0_30 = arith.constant 0 : index
    %58 = vector.load %arg5[%c0_29, %c0_30] : memref<1x64xf32, #tpu.memory_space<vmem>>, vector<1x64xf32>
    %59 = vector.broadcast %58 : vector<1x64xf32> to vector<32x64xf32>
    %60 = arith.addf %57, %59 : vector<32x64xf32>
    %cst_31 = arith.constant 0.000000e+00 : f32
    %61 = vector.broadcast %cst_31 : f32 to vector<32x64xf32>
    %62 = arith.cmpf ogt, %60, %61 : vector<32x64xf32>
    %cst_32 = arith.constant 2.000000e-01 : f32
    %63 = vector.broadcast %cst_32 : f32 to vector<32x64xf32>
    %64 = arith.mulf %63, %60 : vector<32x64xf32>
    %65 = arith.select %62, %60, %64 : vector<32x64xi1>, vector<32x64xf32>
    %c0_33 = arith.constant 0 : index
    %c0_34 = arith.constant 0 : index
    %66 = vector.load %arg15[%c0_33, %c0_34] : memref<32x64xf32, #tpu.memory_space<vmem>>, vector<32x64xf32>
    tpu.vector_store %arg15[%c0_33, %c0_34], %65 {strides = array<i32>} : memref<32x64xf32, #tpu.memory_space<vmem>>, vector<32x64xf32>,
    %c0_35 = arith.constant 0 : index
    %c0_36 = arith.constant 0 : index
    %67 = tpu.strided_load %arg15[%c0_35, %c0_36] {strides = array<i32: 2, 1>} : memref<32x64xf32, #tpu.memory_space<vmem>>, vector<16x64xf32>
    %c1_37 = arith.constant 1 : index
    %c0_38 = arith.constant 0 : index
    %68 = tpu.strided_load %arg15[%c1_37, %c0_38] {strides = array<i32: 2, 1>} : memref<32x64xf32, #tpu.memory_space<vmem>>, vector<16x64xf32>
    %69 = tpu.iota {dimensions = array<i32: 0>} : vector<16x1xi32>
    %c3_i32 = arith.constant 3 : i32
    %70 = vector.broadcast %c3_i32 : i32 to vector<16x1xi32>
    %71 = arith.andi %69, %70 : vector<16x1xi32>
    %c0_i32_39 = arith.constant 0 : i32
    %72 = vector.broadcast %c0_i32_39 : i32 to vector<16x1xi32>
    %73 = arith.cmpi eq, %71, %72 : vector<16x1xi32>
    %c1_i32_40 = arith.constant 1 : i32
    %74 = tpu.dynamic_rotate %68 by %c1_i32_40 dim 0 : vector<16x64xf32>, i32 -> vector<16x64xf32>
    %cst_41 = arith.constant 0.000000e+00 : f32
    %75 = vector.shape_cast %73 : vector<16x1xi1> to vector<16x1xi1>
    %76 = vector.broadcast %75 : vector<16x1xi1> to vector<16x64xi1>
    %77 = vector.broadcast %cst_41 : f32 to vector<16x64xf32>
    %78 = arith.select %76, %77, %74 : vector<16x64xi1>, vector<16x64xf32>
    %c3_i32_42 = arith.constant 3 : i32
    %79 = vector.broadcast %c3_i32_42 : i32 to vector<16x1xi32>
    %80 = arith.cmpi eq, %71, %79 : vector<16x1xi32>
    %c15_i32_43 = arith.constant 15 : i32
    %81 = tpu.dynamic_rotate %67 by %c15_i32_43 dim 0 : vector<16x64xf32>, i32 -> vector<16x64xf32>
    %cst_44 = arith.constant 0.000000e+00 : f32
    %82 = vector.shape_cast %80 : vector<16x1xi1> to vector<16x1xi1>
    %83 = vector.broadcast %82 : vector<16x1xi1> to vector<16x64xi1>
    %84 = vector.broadcast %cst_44 : f32 to vector<16x64xf32>
    %85 = arith.select %83, %84, %81 : vector<16x64xi1>, vector<16x64xf32>
    %86 = tpu.concatenate %78, %67, %68, %85 in 1 : vector<16x64xf32>, vector<16x64xf32>, vector<16x64xf32>, vector<16x64xf32> -> vector<16x256xf32>
    %87 = arith.truncf %86 : vector<16x256xf32> to vector<16x256xbf16>
    %c0_45 = arith.constant 0 : index
    %c0_46 = arith.constant 0 : index
    %88 = vector.load %arg6[%c0_45, %c0_46] : memref<256x128xbf16, #tpu.memory_space<vmem>>, vector<256x128xbf16>
    %cst_47 = arith.constant dense<0.000000e+00> : vector<16x128xf32>
    %89 = tpu.matmul %87, %88, %cst_47 {dimension_numbers = #tpu.dot_dimension_numbers<[1], [0], [0], [1], [0, 0, 1, 1], [], []>} : vector<16x256xbf16>, vector<256x128xbf16>, vector<16x128xf32> -> vector<16x128xf32>
    %c0_48 = arith.constant 0 : index
    %c0_49 = arith.constant 0 : index
    %90 = vector.load %arg7[%c0_48, %c0_49] : memref<1x128xf32, #tpu.memory_space<vmem>>, vector<1x128xf32>
    %91 = vector.broadcast %90 : vector<1x128xf32> to vector<16x128xf32>
    %92 = arith.addf %89, %91 : vector<16x128xf32>
    %cst_50 = arith.constant 0.000000e+00 : f32
    %93 = vector.broadcast %cst_50 : f32 to vector<16x128xf32>
    %94 = arith.cmpf ogt, %92, %93 : vector<16x128xf32>
    %cst_51 = arith.constant 2.000000e-01 : f32
    %95 = vector.broadcast %cst_51 : f32 to vector<16x128xf32>
    %96 = arith.mulf %95, %92 : vector<16x128xf32>
    %97 = arith.select %94, %92, %96 : vector<16x128xi1>, vector<16x128xf32>
    %98 = arith.truncf %97 : vector<16x128xf32> to vector<16x128xbf16>
    %c0_52 = arith.constant 0 : index
    %c0_53 = arith.constant 0 : index
    %99 = vector.load %arg8[%c0_52, %c0_53] : memref<128x256xbf16, #tpu.memory_space<vmem>>, vector<128x256xbf16>
    %cst_54 = arith.constant dense<0.000000e+00> : vector<16x256xf32>
    %100 = tpu.matmul %98, %99, %cst_54 {dimension_numbers = #tpu.dot_dimension_numbers<[1], [0], [0], [1], [0, 0, 1, 1], [], []>} : vector<16x128xbf16>, vector<128x256xbf16>, vector<16x256xf32> -> vector<16x256xf32>
    %c0_55 = arith.constant 0 : index
    %c0_56 = arith.constant 0 : index
    %101 = vector.load %arg9[%c0_55, %c0_56] : memref<1x256xf32, #tpu.memory_space<vmem>>, vector<1x256xf32>
    %102 = vector.broadcast %101 : vector<1x256xf32> to vector<16x256xf32>
    %103 = arith.addf %100, %102 : vector<16x256xf32>
    %cst_57 = arith.constant 0.000000e+00 : f32
    %104 = vector.broadcast %cst_57 : f32 to vector<16x256xf32>
    %105 = arith.cmpf ogt, %103, %104 : vector<16x256xf32>
    %cst_58 = arith.constant 2.000000e-01 : f32
    %106 = vector.broadcast %cst_58 : f32 to vector<16x256xf32>
    %107 = arith.mulf %106, %103 : vector<16x256xf32>
    %108 = arith.select %105, %103, %107 : vector<16x256xi1>, vector<16x256xf32>
    %109 = arith.truncf %108 : vector<16x256xf32> to vector<16x256xbf16>
    %c0_59 = arith.constant 0 : index
    %c0_60 = arith.constant 0 : index
    %110 = vector.load %arg10[%c0_59, %c0_60] : memref<256x512xbf16, #tpu.memory_space<vmem>>, vector<256x512xbf16>
    %cst_61 = arith.constant dense<0.000000e+00> : vector<16x512xf32>
    %111 = tpu.matmul %109, %110, %cst_61 {dimension_numbers = #tpu.dot_dimension_numbers<[1], [0], [0], [1], [0, 0, 1, 1], [], []>} : vector<16x256xbf16>, vector<256x512xbf16>, vector<16x512xf32> -> vector<16x512xf32>
    %c0_62 = arith.constant 0 : index
    %c0_63 = arith.constant 0 : index
    %112 = vector.load %arg11[%c0_62, %c0_63] : memref<1x512xf32, #tpu.memory_space<vmem>>, vector<1x512xf32>
    %113 = vector.broadcast %112 : vector<1x512xf32> to vector<16x512xf32>
    %114 = arith.addf %111, %113 : vector<16x512xf32>
    %cst_64 = arith.constant 0.000000e+00 : f32
    %115 = vector.broadcast %cst_64 : f32 to vector<16x512xf32>
    %116 = arith.cmpf ogt, %114, %115 : vector<16x512xf32>
    %cst_65 = arith.constant 2.000000e-01 : f32
    %117 = vector.broadcast %cst_65 : f32 to vector<16x512xf32>
    %118 = arith.mulf %117, %114 : vector<16x512xf32>
    %119 = arith.select %116, %114, %118 : vector<16x512xi1>, vector<16x512xf32>
    %c0_66 = arith.constant 0 : index
    %c0_67 = arith.constant 0 : index
    %120 = vector.load %arg12[%c0_66, %c0_67] : memref<16x512xf32, #tpu.memory_space<vmem>>, vector<16x512xf32>
    tpu.vector_store %arg12[%c0_66, %c0_67], %119 {strides = array<i32>} : memref<16x512xf32, #tpu.memory_space<vmem>>, vector<16x512xf32>,
    return
  }
  func.func @transform_0(%arg0: i32) -> (i32, i32) {
    %c0_i32 = arith.constant 0 : i32
    %c0_i32_0 = arith.constant 0 : i32
    return %arg0, %c0_i32 : i32, i32
  }
  func.func @transform_1(%arg0: i32) -> (i32, i32) {
    %c0_i32 = arith.constant 0 : i32
    %c0_i32_0 = arith.constant 0 : i32
    %c0_i32_1 = arith.constant 0 : i32
    return %c0_i32, %c0_i32_0 : i32, i32
  }
  func.func @transform_2(%arg0: i32) -> (i32, i32) {
    %c0_i32 = arith.constant 0 : i32
    %c0_i32_0 = arith.constant 0 : i32
    %c0_i32_1 = arith.constant 0 : i32
    return %c0_i32, %c0_i32_0 : i32, i32
  }
  func.func @transform_3(%arg0: i32) -> (i32, i32) {
    %c0_i32 = arith.constant 0 : i32
    %c0_i32_0 = arith.constant 0 : i32
    %c0_i32_1 = arith.constant 0 : i32
    return %c0_i32, %c0_i32_0 : i32, i32
  }
  func.func @transform_4(%arg0: i32) -> (i32, i32) {
    %c0_i32 = arith.constant 0 : i32
    %c0_i32_0 = arith.constant 0 : i32
    %c0_i32_1 = arith.constant 0 : i32
    return %c0_i32, %c0_i32_0 : i32, i32
  }
  func.func @transform_5(%arg0: i32) -> (i32, i32) {
    %c0_i32 = arith.constant 0 : i32
    %c0_i32_0 = arith.constant 0 : i32
    %c0_i32_1 = arith.constant 0 : i32
    return %c0_i32, %c0_i32_0 : i32, i32
  }
  func.func @transform_6(%arg0: i32) -> (i32, i32) {
    %c0_i32 = arith.constant 0 : i32
    %c0_i32_0 = arith.constant 0 : i32
    %c0_i32_1 = arith.constant 0 : i32
    return %c0_i32, %c0_i32_0 : i32, i32
  }
  func.func @transform_7(%arg0: i32) -> (i32, i32) {
    %c0_i32 = arith.constant 0 : i32
    %c0_i32_0 = arith.constant 0 : i32
    %c0_i32_1 = arith.constant 0 : i32
    return %c0_i32, %c0_i32_0 : i32, i32
  }
  func.func @transform_8(%arg0: i32) -> (i32, i32) {
    %c0_i32 = arith.constant 0 : i32
    %c0_i32_0 = arith.constant 0 : i32
    %c0_i32_1 = arith.constant 0 : i32
    return %c0_i32, %c0_i32_0 : i32, i32
  }
  func.func @transform_9(%arg0: i32) -> (i32, i32) {
    %c0_i32 = arith.constant 0 : i32
    %c0_i32_0 = arith.constant 0 : i32
    %c0_i32_1 = arith.constant 0 : i32
    return %c0_i32, %c0_i32_0 : i32, i32
  }
  func.func @transform_10(%arg0: i32) -> (i32, i32) {
    %c0_i32 = arith.constant 0 : i32
    %c0_i32_0 = arith.constant 0 : i32
    %c0_i32_1 = arith.constant 0 : i32
    return %c0_i32, %c0_i32_0 : i32, i32
  }
  func.func @transform_11(%arg0: i32) -> (i32, i32) {
    %c0_i32 = arith.constant 0 : i32
    %c0_i32_0 = arith.constant 0 : i32
    return %arg0, %c0_i32 : i32, i32
  }
}

</mosaic_0001>

<bundles_post_ra>
// kernel: tpu_custom_call.1
= control target key start
LH: loop header
LB: loop body
LE: loop exit
PB: predicated region body
PF: predicated region fallthrough
CT: control target
= control target key end

     0   :  { %s3888_s0 = inlined_call_operand.vmem [shape: bf16[384,128], index: 0, kind: input, shape index: {}]   ;;  %s3889_s1 = inlined_call_operand.vmem [shape: bf16[512,32], index: 1, kind: input, shape index: {}]   ;;  %s3890_s2 = inlined_call_operand.vmem [shape: f32[1,32], index: 2, kind: input, shape index: {}]   ;;  %s3891_s3 = inlined_call_operand.vmem [shape: bf16[128,64], index: 3, kind: input, shape index: {}]   ;;  %s3892_s4 = inlined_call_operand.vmem [shape: f32[1,64], index: 4, kind: input, shape index: {}]   ;;  %s3893_s5 = inlined_call_operand.vmem [shape: bf16[256,128], index: 5, kind: input, shape index: {}]   ;;  %s3894_s6 = inlined_call_operand.vmem [shape: f32[1,128], index: 6, kind: input, shape index: {}]   ;;  %s3895_s7 = inlined_call_operand.hbm [shape: bf16[128,256], index: 7, kind: input, shape index: {}]   ;;  %s3896_s8 = inlined_call_operand.vmem [shape: f32[1,256], index: 8, kind: input, shape index: {}]   ;;  %s3897_s9 = inlined_call_operand.hbm [shape: bf16[256,512], index: 9, kind: input, shape index: {}]   ;;  %s3898_s10 = inlined_call_operand.vmem [shape: f32[1,512], index: 10, kind: input, shape index: {}]   ;;  %s3899_s11 = inlined_call_operand.hbm [shape: f32[48,512], index: 11, kind: output, shape index: {}]  }
   0x1   :  { %3901 = sst [smem:[#allocation16_spill]] %s3895_s7 }
   0x2   :  { %16 = vsyncpa [#allocation6], 0 }
   0x3   :  { %17 = vsyncpa [#allocation9], 0 }
   0x4   :  { %18 = vsyncpa [#allocation7], 0 }
   0x5   :  { %20 = vsyncpa [#allocation7 + $0x1], 0  ;;  %s3373_s17 = smov 0   ;;  %s3375_s18 = smov 0  }
   0x6   :  { %s3377_s19 = smov 0   ;;  %s3379_s20 = smov 0  }
   0x7 LB: > { %3902 = sst [smem:[#allocation14_spill]] %s3296_s19  ;;  %s3394_s21 = sadd.s32 4294967295, %s3300_s20   ;;  %s3300_s20 = sphi %s3379_s20, %s3918_s20   ;;  %s3296_s19 = sphi %s3377_s19, %s3915_s19   ;;  %s3292_s18 = sphi %s3375_s18, %s3917_s18   ;;  %s3288_s17 = sphi %s3373_s17, %s3916_s17  }
   0x8   : > { %s2280_s22 = sadd.s32 4294967294, %s3300_s20   ;;  %s3398_s23 = sadd.s32 1, %s3300_s20  }
   0x9   : > { %s269_s24 = sadd.s32 1, %s3296_s19  ;;  %s266_s25 = ssub.s32 %s3300_s20, %s3398_s23 }
   0xa   : > { %p279_p0 = scmp.ne.s32.totalorder %s3296_s19, %s3292_s18  ;;  %p267_p1 = scmp.eq.s32.totalorder %s266_s25, 0 }
   0xb   : > { %p280_p2 = scmp.eq.s32.totalorder %s3394_s21, 2  ;;  %p285_p3 = scmp.ne.s32.totalorder %s3292_s18, %s3288_s17 }
   0xc   : > { %p286_p4 = scmp.eq.s32.totalorder %s2280_s22, 2  ;;  %p2281_p7 = scmp.ge.s32.totalorder %s3300_s20, 1 }
   0xd   : > { %s3409_s26 = scalar_select %p267_p1, %s3296_s19, %s269_s24  }
   0xe   : > { %p3411_p5 = por %p280_p2, %p279_p0  ;;  %p3415_p6 = por %p286_p4, %p285_p3 }
   0xf   : > { %3903 = sst [smem:[#allocation15_spill]] %s3409_s26  ;;  %p293_p8 = scmp.lt.s32.totalorder %s3300_s20, 4 }
  0x10   : > { %p3079_p9 = scmp.eq.s32.totalorder %s3394_s21, 0  ;;  %s3907_s7 = sld [smem:[#allocation16_spill]] }
  0x11   : > { %p3422_p10 = pnand %p2281_p7, %p293_p8  ;;  %s3302_s14 = smov [#allocation5]  }
  0x12   : > { %s324_s15 = sshll.u32 %s3302_s14, 4  ;;  %s339_s24 = sshll.u32 %s3897_s9, 4  ;;  %s325_s15 = int_to_ptr.vmem [resolvable:$true] %s324_s15  ;;  %s340_s24 = int_to_ptr.hbm [resolvable:$true] %s339_s24 }
  0x13   : > { %p3068_p11 = pneg %p3422_p10  ;;  %s3303_s25 = smov 128  }
  0x14   : > { %s3304_s26 = smov 8   ;;  %s3305_s19 = smov [#allocation8]  }
  0x15   : > { %p3069_p12 = pnand %p3079_p9, %p3068_p11  ;;  %s341_s30 = sshll.u32 %s3305_s19, 4  ;;  %s342_s30 = int_to_ptr.vmem [resolvable:$true] %s341_s30 }
  0x16   : > { %s322_s13 = sshll.u32 %s3907_s7, 4  ;;  %s3306_s12 = smov 256   ;;  %s323_s13 = int_to_ptr.hbm [resolvable:$true] %s322_s13 }
  0x17   : > { %3071 = dma.hbm_to_vmem [thread:$0]  (!%p3069_p12), %s323_s13, 2048, %s325_s15, [#allocation6], %s3303_s25, %s3303_s25, %s3304_s26  }
  0x18   : > { %s3307_s7 = smov 16   ;;  %369 = sbr.rel (%p3422_p10) target bundleno = 1129 (0x469), region = 64 }
  0x19   : > { %3074 = dma.hbm_to_vmem [thread:$0]  (!%p3069_p12), %s340_s24, 8192, %s342_s30, [#allocation9], %s3306_s12, %s3306_s12, %s3307_s7  }
  0x1d   : > { %3275 = dma.done.wait (%p3079_p9), [#allocation6], 2048  }
  0x1e   : > { %3277 = vsyncadd (%p3079_p9), [#allocation6], 4294965248 }
  0x1f   : > { %3279 = dma.done.wait (%p3079_p9), [#allocation9], 8192  }
  0x20   : > { %3281 = vsyncadd (%p3079_p9), [#allocation9], 4294959104  ;;  %s2289_s19 = sshll.u32 %s3394_s21, 4  ;;  %v2880_v0 = vld [vmem:[%s3889_s1 + $0x38] sm:$0xff]  ;;  %v2879_v4 = vld [vmem:[%s3889_s1 + $0x30] sm:$0xff]  ;;  %v501_v13 = vlaneseq  ;;  %vm3308_vm4 = vmmov 1  }
  0x21   : > { %p416_p13 = scmp.lt.s32.totalorder %s2289_s19, 47  ;;  %v2888_v1 = vld [vmem:[%s3889_s1 + $0x78] sm:$0xff]  ;;  %892 = vmatpush.bf16.msra.mxu0 %v2880_v0  ;;  %v2887_v5 = vld [vmem:[%s3889_s1 + $0x70] sm:$0xff]  ;;  %v2878_v8 = vld [vmem:[%s3889_s1 + $0x28] sm:$0xff]  ;;  %s3309_s25 = smov 32  }
  0x22   : > { %v2896_v2 = vld [vmem:[%s3889_s1 + $0xb8] sm:$0xff]  ;;  %921 = vmatpush.bf16.msra.mxu1 %v2888_v1  ;;  %v2895_v6 = vld [vmem:[%s3889_s1 + $0xb0] sm:$0xff]  ;;  %v2886_v9 = vld [vmem:[%s3889_s1 + $0x68] sm:$0xff]  ;;  %v3510_v28 = vshrl.u32 %v501_v13, 7  ;;  %s3311_s16 = smov 96   ;;  %s412_s30 = sand.u32 1, %s3292_s18  }
  0x23   : > { %s3920_s19 = smov (!%p416_p13, %s2289_s19), 47  ;;  %v2904_v3 = vld [vmem:[%s3889_s1 + $0xf8] sm:$0xff]  ;;  %950 = vmatpush.bf16.msra.mxu2 %v2896_v2  ;;  %v2903_v7 = vld [vmem:[%s3889_s1 + $0xf0] sm:$0xff]  ;;  %v2894_v10 = vld [vmem:[%s3889_s1 + $0xa8] sm:$0xff]  ;;  %s2288_s12 = sshll.u32 %s412_s30, 6 }
  0x24   : > { %979 = vmatpush.bf16.msra.mxu3 %v2904_v3  ;;  %s2290_s14 = sshll.u32 %s3920_s19, 2  ;;  %v2902_v11 = vld [vmem:[%s3889_s1 + $0xe8] sm:$0xff]  ;;  %v2877_v12 = vld [vmem:[%s3889_s1 + $0x20] sm:$0xff]  ;;  %v2876_v25 = vld [vmem:[%s3889_s1 + $0x18] sm:$0xff]  ;;  %v3527_v39 = vadd.s32 8, %v3510_v28  ;;  %v510_v45 = vand.u32 15, %v3510_v28 }
  0x25   : > { %893 = vmatpush.bf16.msra.mxu0 %v2879_v4  ;;  %s3486_s29 = scalar_lea.vmem %s3888_s0, %s2290_s14  ;;  %v2885_v14 = vld [vmem:[%s3889_s1 + $0x60] sm:$0xff]  ;;  %v2884_v26 = vld [vmem:[%s3889_s1 + $0x58] sm:$0xff]  ;;  %v2875_v37 = vld [vmem:[%s3889_s1 + $0x10] sm:$0xff]  ;;  %vm534_vm0 = vcmp.lt.s32.totalorder %v3510_v28, 1  ;;  %vm583_vm1 = vcmp.lt.s32.totalorder %v3510_v28, 7  ;;  %s3841_s26 = scalar_lea.vmem [#allocation10], %s2288_s12 }
  0x26   : > { %922 = vmatpush.bf16.msra.mxu1 %v2887_v5  ;;  %v2893_v15 = vld [vmem:[%s3889_s1 + $0xa0] sm:$0xff]  ;;  %v3043_v20 = vld [vmem:[%s3486_s29 + $0x8] sm:$0xff]   ;;  %v3049_v21 = vld [vmem:[%s3486_s29 + $0x38] sm:$0xff]   ;;  %v511_v55 = vand.u32 15, %v3527_v39  ;;  %vm3050_vm2 = vcmp.ne.s32.totalorder %v510_v45, 0  ;;  %s3010_s19 = sshll.u32 %s3394_s21, 6 }
  0x27   : > { %951 = vmatpush.bf16.msra.mxu2 %v2895_v6  ;;  %v3012_v16 = vld [vmem:[%s3486_s29] sm:$0xff]   ;;  %v3017_v22 = vunpack.c.l.bf16 %v3043_v20  ;;  %v3018_v23 = vunpack.c.h.bf16 %v3043_v20  ;;  %v3044_v24 = vld [vmem:[%s3486_s29 + $0x10] sm:$0xff]   ;;  %v3041_v27 = vunpack.c.l.bf16 %v3049_v21  ;;  %v3042_v29 = vunpack.c.h.bf16 %v3049_v21  ;;  %v3045_v30 = vld [vmem:[%s3486_s29 + $0x18] sm:$0xff]   ;;  %s2193_s15 = sshll.u32 %s3841_s26, 4  ;;  %s2180_s21 = scalar_lea.sflag [#allocation7], %s412_s30  ;;  %s2194_s15 = int_to_ptr.vmem [resolvable:$true] %s2193_s15 }
  0x28   : > { %980 = vmatpush.bf16.msra.mxu3 %v2903_v7  ;;  %v2901_v17 = vld [vmem:[%s3889_s1 + $0xe0] sm:$0xff]  ;;  %v3013_v18 = vunpack.c.l.bf16 %v3012_v16  ;;  %v3014_v19 = vunpack.c.h.bf16 %v3012_v16  ;;  %v2892_v31 = vld [vmem:[%s3889_s1 + $0x98] sm:$0xff]  ;;  %v3021_v33 = vunpack.c.l.bf16 %v3044_v24  ;;  %v3022_v34 = vunpack.c.h.bf16 %v3044_v24  ;;  %v2883_v38 = vld [vmem:[%s3889_s1 + $0x50] sm:$0xff] }
  0x29   : > { %894 = vmatpush.bf16.msra.mxu0 %v2878_v8  ;;  %v2900_v32 = vld [vmem:[%s3889_s1 + $0xd8] sm:$0xff]  ;;  %456 = vst [vmem:[#allocation2 + $0x10] sm:$0xff] %v3017_v22  ;;  %v3046_v35 = vld [vmem:[%s3486_s29 + $0x20] sm:$0xff]   ;;  %v3025_v36 = vunpack.c.l.bf16 %v3045_v30  ;;  %v3026_v40 = vunpack.c.h.bf16 %v3045_v30  ;;  %v3047_v41 = vld [vmem:[%s3486_s29 + $0x28] sm:$0xff]   ;;  %vm3054_vm3 = vcmp.ne.s32.totalorder %v511_v55, 15  ;;  %v3590_v22 = vadd.s32 24, %v3510_v28 }
  0x2a   : > { %923 = vmatpush.bf16.msra.mxu1 %v2886_v9  ;;  %454 = vst [vmem:[#allocation2] sm:$0xff] %v3013_v18  ;;  %v2891_v42 = vld [vmem:[%s3889_s1 + $0x90] sm:$0xff]  ;;  %v3029_v44 = vunpack.c.l.bf16 %v3046_v35  ;;  %v3030_v46 = vunpack.c.h.bf16 %v3046_v35  ;;  %v3033_v50 = vunpack.c.l.bf16 %v3047_v41  ;;  %v2874_v51 = vld [vmem:[%s3889_s1 + $0x8] sm:$0xff]  ;;  %v3034_v56 = vunpack.c.h.bf16 %v3047_v41  ;;  %v2873_v2 = vld [vmem:[%s3889_s1] sm:$0xff] }
  0x2b   : > { %952 = vmatpush.bf16.msra.mxu2 %v2894_v10  ;;  %455 = vst [vmem:[#allocation2 + $0x8] sm:$0xff] %v3014_v19  ;;  %v2899_v43 = vld [vmem:[%s3889_s1 + $0xd0] sm:$0xff]  ;;  %v2882_v52 = vld [vmem:[%s3889_s1 + $0x48] sm:$0xff]  ;;  %v2881_v3 = vld [vmem:[%s3889_s1 + $0x40] sm:$0xff]  ;;  %v3587_v19 = vadd.s32 16, %v3510_v28  ;;  %v506_v41 = vadd.s32 32, %v3510_v28 }
  0x2c   : > { %981 = vmatpush.bf16.msra.mxu3 %v2902_v11  ;;  %457 = vst [vmem:[#allocation2 + $0x18] sm:$0xff] %v3018_v23  ;;  %v3048_v47 = vld [vmem:[%s3486_s29 + $0x30] sm:$0xff]   ;;  %v2890_v53 = vld [vmem:[%s3889_s1 + $0x88] sm:$0xff]  ;;  %v2889_v6 = vld [vmem:[%s3889_s1 + $0x80] sm:$0xff]  ;;  %s3310_s29 = smov 64  }
  0x2d   : > { %895 = vmatpush.bf16.msra.mxu0 %v2877_v12  ;;  %468 = vst [vmem:[#allocation2 + $0x70] sm:$0xff] %v3041_v27  ;;  %v2898_v57 = vld [vmem:[%s3889_s1 + $0xc8] sm:$0xff]  ;;  %v3037_v60 = vunpack.c.l.bf16 %v3048_v47  ;;  %v3038_v0 = vunpack.c.h.bf16 %v3048_v47  ;;  %v2897_v7 = vld [vmem:[%s3889_s1 + $0xc0] sm:$0xff]  ;;  %vm2420_vm5 = vmpackc.low %vm3308_vm4, %vm3050_vm2  ;;  %v514_v47 = vand.u32 15, %v506_v41 }
  0x2e   : > { %924 = vmatpush.bf16.msra.mxu1 %v2885_v14  ;;  %469 = vst [vmem:[#allocation2 + $0x78] sm:$0xff] %v3042_v29  ;;  %vm2436_vm6 = vmpackc.low %vm3054_vm3, %vm3308_vm4  ;;  %v513_v29 = vand.u32 15, %v3590_v22 }
  0x2f   : > { %953 = vmatpush.bf16.msra.mxu2 %v2893_v15  ;;  %458 = vst [vmem:[#allocation2 + $0x20] sm:$0xff] %v3021_v33  ;;  %vm3052_vm11 = vcmp.ne.s32.totalorder %v514_v47, 0 }
  0x30   : > { %982 = vmatpush.bf16.msra.mxu3 %v2901_v17  ;;  %459 = vst [vmem:[#allocation2 + $0x28] sm:$0xff] %v3022_v34  ;;  %vm3055_vm8 = vcmp.ne.s32.totalorder %v513_v29, 15  ;;  %vm2428_vm13 = vmpackc.low %vm3308_vm4, %vm3052_vm11 }
  0x31   : > { %896 = vmatpush.bf16.msra.mxu0 %v2876_v25  ;;  %460 = vst [vmem:[#allocation2 + $0x30] sm:$0xff] %v3025_v36  ;;  %v512_v25 = vand.u32 15, %v3587_v19  ;;  %vm2440_vm10 = vmpackc.low %vm3055_vm8, %vm3308_vm4 }
  0x32   : > { %925 = vmatpush.bf16.msra.mxu1 %v2884_v26  ;;  %v486_v48 = vld [vmem:[#allocation2 + $0x1] ss:$2 sm:$0xff]  ;;  %v3539_v49 = vld [vmem:[#allocation2] ss:$2 sm:$0xff]  ;;  %461 = vst [vmem:[#allocation2 + $0x38] sm:$0xff] %v3026_v40 }
  0x33   : > { %954 = vmatpush.bf16.msra.mxu2 %v2892_v31  ;;  %v526_v54 = vrot.slane %v486_v48, 7  ;;  %v488_v58 = vld [vmem:[#allocation2 + $0x11] ss:$2 sm:$0xff]  ;;  %v472_v59 = vld [vmem:[#allocation2 + $0x10] ss:$2 sm:$0xff]  ;;  %462 = vst [vmem:[#allocation2 + $0x40] sm:$0xff] %v3029_v44 }
  0x34   : > { %983 = vmatpush.bf16.msra.mxu3 %v2900_v32  ;;  %v527_v61 = vrot.slane %v488_v58, 7  ;;  %v575_v62 = vrot.slane %v3539_v49, 1  ;;  %v576_v63 = vrot.slane %v472_v59, 1  ;;  %463 = vst [vmem:[#allocation2 + $0x48] sm:$0xff] %v3030_v46  ;;  %v617_v13 = vpack.c.bf16 %v472_v59, %v3539_v49  ;;  %v3636_v49 = vld [vmem:[%s3890_s2] ss:$0 sm:$0xff] }
  0x35   : > { %897 = vmatpush.bf16.msra.mxu0 %v2875_v37  ;;  %v3555_v1 = vld [vmem:[#allocation2 + $0x71] ss:$2 sm:$0xff]  ;;  %464 = vst [vmem:[#allocation2 + $0x50] sm:$0xff] %v3033_v50  ;;  %v618_v14 = vpack.c.bf16 %v488_v58, %v486_v48  ;;  %vm3051_vm7 = vcmp.ne.s32.totalorder %v512_v25, 0  ;;  %v507_v44 = vadd.s32 40, %v3510_v28 }
  0x36   : > { %926 = vmatpush.bf16.msra.mxu1 %v2883_v38  ;;  %v533_v4 = vrot.slane %v3555_v1, 7  ;;  %v541_v5 = vsel %vm534_vm0, %v526_v54, %v527_v61  ;;  %465 = vst [vmem:[#allocation2 + $0x58] sm:$0xff] %v3034_v56  ;;  %v590_v11 = vsel %vm583_vm1, %v575_v62, %v576_v63  ;;  %vm2424_vm9 = vmpackc.low %vm3308_vm4, %vm3051_vm7 }
  0x37   : > { %955 = vmatpush.bf16.msra.mxu2 %v2891_v42  ;;  %v474_v8 = vld [vmem:[#allocation2 + $0x20] ss:$2 sm:$0xff]  ;;  %466 = vst [vmem:[#allocation2 + $0x60] sm:$0xff] %v3037_v60  ;;  %v490_v17 = vld [vmem:[#allocation2 + $0x21] ss:$2 sm:$0xff] }
  0x38   : > { %984 = vmatpush.bf16.msra.mxu3 %v2899_v43  ;;  %v542_v9 = vsel %vm534_vm0, %v533_v4, %v526_v54  ;;  %v577_v10 = vrot.slane %v474_v8, 1  ;;  %467 = vst [vmem:[#allocation2 + $0x68] sm:$0xff] %v3038_v0  ;;  %v528_v23 = vrot.slane %v490_v17, 7  ;;  %v509_v0 = vadd.s32 56, %v3510_v28 }
  0x39   : > { %898 = vmatpush.bf16.msra.mxu0 %v2874_v51  ;;  %v2421_v12 = vpack.c.bf16 %v541_v5, %v542_v9  ;;  %v492_v18 = vld [vmem:[#allocation2 + $0x31] ss:$2 sm:$0xff]  ;;  %v476_v20 = vld [vmem:[#allocation2 + $0x30] ss:$2 sm:$0xff]  ;;  %v515_v51 = vand.u32 15, %v507_v44 }
  0x3a   : > { %927 = vmatpush.bf16.msra.mxu1 %v2882_v52  ;;  %v589_v15 = vsel %vm583_vm1, %v576_v63, %v577_v10  ;;  %v529_v24 = vrot.slane %v492_v18, 7  ;;  %v578_v26 = vrot.slane %v476_v20, 1  ;;  %v540_v31 = vsel %vm534_vm0, %v527_v61, %v528_v23  ;;  %v484_v63 = vld [vmem:[#allocation2 + $0x70] ss:$2 sm:$0xff] }
  0x3b   : > { %956 = vmatpush.bf16.msra.mxu2 %v2890_v53  ;;  %v2437_v16 = vpack.c.bf16 %v589_v15, %v590_v11  ;;  %v478_v21 = vld [vmem:[#allocation2 + $0x40] ss:$2 sm:$0xff]  ;;  %v621_v35 = vpack.c.bf16 %v476_v20, %v474_v8  ;;  %v622_v36 = vpack.c.bf16 %v492_v18, %v490_v17  ;;  %v494_v38 = vld [vmem:[#allocation2 + $0x41] ss:$2 sm:$0xff]  ;;  %vm3056_vm12 = vcmp.ne.s32.totalorder %v515_v51, 15 }
  0x3c   : > { %985 = vmatpush.bf16.msra.mxu3 %v2898_v57  ;;  %v579_v27 = vrot.slane %v478_v21, 1  ;;  %v539_v30 = vsel %vm534_vm0, %v528_v23, %v529_v24  ;;  %v588_v33 = vsel %vm583_vm1, %v577_v10, %v578_v26  ;;  %v530_v45 = vrot.slane %v494_v38, 7  ;;  %vm2444_vm14 = vmpackc.low %vm3056_vm12, %vm3308_vm4 }
  0x3d   : > { %899 = vmatpush.bf16.msra.mxu0 %v2873_v2  ;;  %v2425_v34 = vpack.c.bf16 %v539_v30, %v540_v31  ;;  %v496_v40 = vld [vmem:[#allocation2 + $0x51] ss:$2 sm:$0xff]  ;;  %v480_v42 = vld [vmem:[#allocation2 + $0x50] ss:$2 sm:$0xff]  ;;  %v508_v61 = vadd.s32 48, %v3510_v28  ;;  %v582_v5 = vrot.slane %v484_v63, 1 }
  0x3e   : > { %928 = vmatpush.bf16.msra.mxu1 %v2881_v3  ;;  %v587_v32 = vsel %vm583_vm1, %v578_v26, %v579_v27  ;;  %v531_v46 = vrot.slane %v496_v40, 7  ;;  %v580_v48 = vrot.slane %v480_v42, 1  ;;  %v538_v53 = vsel %vm534_vm0, %v529_v24, %v530_v45 }
  0x3f   : > { %957 = vmatpush.bf16.msra.mxu2 %v2889_v6  ;;  %v2441_v37 = vpack.c.bf16 %v587_v32, %v588_v33  ;;  %v482_v43 = vld [vmem:[#allocation2 + $0x60] ss:$2 sm:$0xff]  ;;  %v625_v57 = vpack.c.bf16 %v480_v42, %v478_v21  ;;  %v626_v58 = vpack.c.bf16 %v496_v40, %v494_v38  ;;  %v498_v60 = vld [vmem:[#allocation2 + $0x61] ss:$2 sm:$0xff]  ;;  %v516_v3 = vand.u32 15, %v508_v61 }
  0x40   : > { %986 = vmatpush.bf16.msra.mxu3 %v2897_v7  ;;  %2422 = vmatmul.msk.bf16.vlgmr.msra.gmra.mxu0 %vm2420_vm5, %v2421_v12  ;;  %v581_v50 = vrot.slane %v482_v43, 1  ;;  %v537_v52 = vsel %vm534_vm0, %v530_v45, %v531_v46  ;;  %v586_v55 = vsel %vm583_vm1, %v579_v27, %v580_v48  ;;  %v532_v2 = vrot.slane %v498_v60, 7 }
  0x41   : > { %929 = vmatmul.bf16.vlgmr.msra.gmra.mxu1 %v617_v13  ;;  %v2429_v56 = vpack.c.bf16 %v537_v52, %v538_v53  ;;  %v517_v6 = vand.u32 15, %v509_v0  ;;  %vm3053_vm15 = vcmp.ne.s32.totalorder %v516_v3, 0  ;;  %v591_v10 = vsel %vm583_vm1, %v582_v5, %v575_v62 }
  0x42   : > { %958 = vmatmul.bf16.vlgmr.msra.gmra.mxu2 %v618_v14  ;;  %v585_v54 = vsel %vm583_vm1, %v580_v48, %v581_v50  ;;  %v535_v7 = vsel %vm534_vm0, %v532_v2, %v533_v4  ;;  %v536_v8 = vsel %vm534_vm0, %v531_v46, %v532_v2  ;;  %v584_v9 = vsel %vm583_vm1, %v581_v50, %v582_v5  ;;  %vm2432_vm3 = vmpackc.low %vm3308_vm4, %vm3053_vm15 }
  0x43   : > { %2438 = vmatmul.msk.bf16.vlgmr.msra.gmra.mxu3 %vm2436_vm6, %v2437_v16  ;;  %v2445_v59 = vpack.c.bf16 %v585_v54, %v586_v55  ;;  %vm3057_vm2 = vcmp.ne.s32.totalorder %v517_v6, 15  ;;  %v2433_v11 = vpack.c.bf16 %v535_v7, %v536_v8  ;;  %v629_v12 = vpack.c.bf16 %v484_v63, %v482_v43 }
  0x44   : > { %v630_v13 = vpack.c.bf16 %v3555_v1, %v498_v60  ;;  %v2449_v4 = vpack.c.bf16 %v591_v10, %v584_v9  ;;  %vm2448_vm5 = vmpackc.low %vm3057_vm2, %vm3308_vm4  ;;  %vm1032_vm6 = vcmask 261120   ;;  %v1057_v8 = vand.u32 7, %v3527_v39 }
  0x46   : > { %vm3656_vm11 = vcmp.eq.s32.totalorder %v1057_v8, 0  ;;  %vm1085_vm15 = vcmp.eq.s32.totalorder %v1057_v8, 7  ;;  %v1058_v8 = vand.u32 7, %v3587_v19 }
  0x50   : > { %2426 = vmatmul.msk.bf16.gmra.mxu0 %vm2424_vm9, %v2425_v34 }
  0x51   : > { %934 = vmatmul.bf16.gmra.mxu1 %v621_v35 }
  0x52   : > { %963 = vmatmul.bf16.gmra.mxu2 %v622_v36 }
  0x53   : > { %2442 = vmatmul.msk.bf16.gmra.mxu3 %vm2440_vm10, %v2441_v37 }
  0x60   : > { %2430 = vmatmul.msk.bf16.gmra.mxu0 %vm2428_vm13, %v2429_v56 }
  0x61   : > { %939 = vmatmul.bf16.gmra.mxu1 %v625_v57 }
  0x62   : > { %968 = vmatmul.bf16.gmra.mxu2 %v626_v58 }
  0x63   : > { %2446 = vmatmul.msk.bf16.gmra.mxu3 %vm2444_vm14, %v2445_v59 }
  0x70   : > { %2434 = vmatmul.msk.bf16.gmra.mxu0 %vm2432_vm3, %v2433_v11 }
  0x71   : > { %944 = vmatmul.bf16.gmra.mxu1 %v629_v12 }
  0x72   : > { %973 = vmatmul.bf16.gmra.mxu2 %v630_v13 }
  0x73   : > { %2450 = vmatmul.msk.bf16.gmra.mxu3 %vm2448_vm5, %v2449_v4  ;;  %vm1086_vm5 = vcmp.eq.s32.totalorder %v1058_v8, 7 }
  0xbd   : > { %v901_v62 = vpop.f32.mrf.mxu0 }
  0xbe   : > { %v930_v14 = vpop.f32.mrf.mxu1  ;;  %v902_v15 = vadd.f32 %v3636_v49, %v901_v62 }
  0xc0   : > { %v931_v16 = vadd.f32 %v930_v14, %v902_v15 }
  0xc5   : > { %v959_v17 = vpop.f32.mrf.mxu2  ;;  %v903_v20 = vpop.f32.mrf.mxu0 }
  0xc6   : > { %v988_v18 = vpop.f32.mrf.mxu3  ;;  %v960_v1 = vadd.f32 %v959_v17, %v931_v16  ;;  %v932_v21 = vpop.f32.mrf.mxu1  ;;  %v904_v24 = vadd.f32 %v3636_v49, %v903_v20 }
  0xc8   : > { %v989_v23 = vadd.f32 %v988_v18, %v960_v1  ;;  %v933_v27 = vadd.f32 %v932_v21, %v904_v24 }
  0xca   : > { %vm1008_vm4 = vcmp.gt.f32.partialorder %v989_v23, 0.0  ;;  %v1016_v25 = vmul.f32 0.2, %v989_v23 }
  0xcc   : > { %v1024_v26 = vsel %vm1008_vm4, %v989_v23, %v1016_v25 }
  0xcd   : > { %1033 = vst.msk [vmem:[#allocation3] sm:$0xff] %vm1032_vm6, %v1024_v26  ;;  %v961_v29 = vpop.f32.mrf.mxu2  ;;  %v906_v32 = vpop.f32.mrf.mxu0 }
  0xce   : > { %v990_v30 = vpop.f32.mrf.mxu3  ;;  %v962_v31 = vadd.f32 %v961_v29, %v933_v27  ;;  %v935_v33 = vpop.f32.mrf.mxu1  ;;  %v907_v34 = vadd.f32 %v3636_v49, %v906_v32 }
  0xd0   : > { %v991_v35 = vadd.f32 %v990_v30, %v962_v31  ;;  %v936_v37 = vadd.f32 %v935_v33, %v907_v34 }
  0xd2   : > { %vm1009_vm7 = vcmp.gt.f32.partialorder %v991_v35, 0.0  ;;  %v1017_v36 = vmul.f32 0.2, %v991_v35 }
  0xd4   : > { %v1025_v38 = vsel %vm1009_vm7, %v991_v35, %v1017_v36  ;;  %v2912_v36 = vld [vmem:[%s3891_s3 + $0x38] sm:$0xff]  ;;  %vm1160_vm7 = vcmask 523264  }
  0xd5   : > { %1034 = vst.msk [vmem:[#allocation3 + $0x8] sm:$0xff] %vm1032_vm6, %v1025_v38  ;;  %v964_v40 = vpop.f32.mrf.mxu2  ;;  %v908_v43 = vpop.f32.mrf.mxu0  ;;  %1240 = vmatpush.bf16.msrb.mxu0 %v2912_v36 }
  0xd6   : > { %v993_v41 = vpop.f32.mrf.mxu3  ;;  %v965_v42 = vadd.f32 %v964_v40, %v936_v37  ;;  %v937_v44 = vpop.f32.mrf.mxu1  ;;  %v909_v46 = vadd.f32 %v3636_v49, %v908_v43  ;;  %v1056_v40 = vand.u32 7, %v3510_v28 }
  0xd8   : > { %v994_v45 = vadd.f32 %v993_v41, %v965_v42  ;;  %v938_v50 = vadd.f32 %v937_v44, %v909_v46  ;;  %v2911_v42 = vld [vmem:[%s3891_s3 + $0x30] sm:$0xff]  ;;  %vm3683_vm14 = vcmp.eq.s32.totalorder %v1056_v40, 7  ;;  %vm3710_vm3 = vcmp.eq.s32.totalorder %v1056_v40, 0 }
  0xd9   : > { %1241 = vmatpush.bf16.msrb.mxu0 %v2911_v42 }
  0xda   : > { %vm1010_vm8 = vcmp.gt.f32.partialorder %v994_v45, 0.0  ;;  %v1018_v47 = vmul.f32 0.2, %v994_v45 }
  0xdc   : > { %v1026_v48 = vsel %vm1010_vm8, %v994_v45, %v1018_v47  ;;  %v3649_v9 = vld [vmem:[#allocation3 + $0x1] ss:$2 sm:$0xff]  ;;  %v3651_v12 = vld [vmem:[#allocation3] ss:$2 sm:$0xff]  ;;  %vm1165_vm8 = vcmask 785408  }
  0xdd   : > { %1035 = vst.msk [vmem:[#allocation3 + $0x10] sm:$0xff] %vm1032_vm6, %v1026_v48  ;;  %v966_v51 = vpop.f32.mrf.mxu2  ;;  %v911_v54 = vpop.f32.mrf.mxu0  ;;  %v1064_v1 = vrot.slane %v3649_v9, 7  ;;  %v1088_v44 = vrot.slane %v3651_v12, 1 }
  0xde   : > { %v995_v52 = vpop.f32.mrf.mxu3  ;;  %v967_v53 = vadd.f32 %v966_v51, %v938_v50  ;;  %v940_v55 = vpop.f32.mrf.mxu1  ;;  %v912_v56 = vadd.f32 %v3636_v49, %v911_v54 }
  0xe0   : > { %v996_v57 = vadd.f32 %v995_v52, %v967_v53  ;;  %v941_v59 = vadd.f32 %v940_v55, %v912_v56  ;;  %v2910_v55 = vld [vmem:[%s3891_s3 + $0x28] sm:$0xff] }
  0xe1   : > { %1242 = vmatpush.bf16.msrb.mxu0 %v2910_v55 }
  0xe2   : > { %vm1011_vm9 = vcmp.gt.f32.partialorder %v996_v57, 0.0  ;;  %v1019_v58 = vmul.f32 0.2, %v996_v57 }
  0xe4   : > { %v1027_v60 = vsel %vm1011_vm9, %v996_v57, %v1019_v58  ;;  %vm1062_vm9 = vcmp.eq.s32.totalorder %v1058_v8, 0  ;;  %v2920_v8 = vld [vmem:[%s3893_s5 + $0x38] sm:$0xff] }
  0xe5   : > { %1036 = vst.msk [vmem:[#allocation3 + $0x18] sm:$0xff] %vm1032_vm6, %v1027_v60  ;;  %v969_v61 = vpop.f32.mrf.mxu2  ;;  %v913_v2 = vpop.f32.mrf.mxu0  ;;  %1462 = vmatpush.bf16.msrb.mxu1 %v2920_v8 }
  0xe6   : > { %v998_v63 = vpop.f32.mrf.mxu3  ;;  %v970_v0 = vadd.f32 %v969_v61, %v941_v59  ;;  %v942_v3 = vpop.f32.mrf.mxu1  ;;  %v914_v6 = vadd.f32 %v3636_v49, %v913_v2  ;;  %v2909_v2 = vld [vmem:[%s3891_s3 + $0x20] sm:$0xff] }
  0xe7   : > { %1243 = vmatpush.bf16.msrb.mxu0 %v2909_v2 }
  0xe8   : > { %v999_v5 = vadd.f32 %v998_v63, %v970_v0  ;;  %v943_v11 = vadd.f32 %v942_v3, %v914_v6  ;;  %v2908_v6 = vld [vmem:[%s3891_s3 + $0x18] sm:$0xff] }
  0xea   : > { %vm1012_vm10 = vcmp.gt.f32.partialorder %v999_v5, 0.0  ;;  %v1020_v7 = vmul.f32 0.2, %v999_v5 }
  0xeb   : > { %1244 = vmatpush.bf16.msrb.mxu0 %v2908_v6 }
  0xec   : > { %v1028_v10 = vsel %vm1012_vm10, %v999_v5, %v1020_v7  ;;  %v1043_v13 = vld [vmem:[#allocation3 + $0x10] ss:$2 sm:$0xff]  ;;  %v1051_v4 = vld [vmem:[#allocation3 + $0x11] ss:$2 sm:$0xff]  ;;  %v1059_v7 = vand.u32 7, %v3590_v22 }
  0xed   : > { %1037 = vst.msk [vmem:[#allocation3 + $0x20] sm:$0xff] %vm1032_vm6, %v1028_v10  ;;  %v971_v62 = vpop.f32.mrf.mxu2  ;;  %v3127_v15 = vpack.i.bf16 %v1043_v13, %v3651_v12  ;;  %v1065_v16 = vrot.slane %v1051_v4, 7  ;;  %v916_v18 = vpop.f32.mrf.mxu0  ;;  %v3132_v33 = vpack.i.bf16 %v1051_v4, %v3649_v9  ;;  %v1089_v41 = vrot.slane %v1043_v13, 1  ;;  %v2907_v9 = vld [vmem:[%s3891_s3 + $0x10] sm:$0xff] }
  0xee   : > { %v1000_v14 = vpop.f32.mrf.mxu3  ;;  %v972_v17 = vadd.f32 %v971_v62, %v943_v11  ;;  %v917_v21 = vadd.f32 %v3636_v49, %v916_v18  ;;  %v945_v25 = vpop.f32.mrf.mxu1  ;;  %vm1087_vm4 = vcmp.eq.s32.totalorder %v1059_v7, 7  ;;  %vm1063_vm10 = vcmp.eq.s32.totalorder %v1059_v7, 0  ;;  %v2928_v7 = vld [vmem:[%s3893_s5 + $0x78] sm:$0xff] }
  0xef   : > { %3128 = vrot.lane.b32.xlu0 %v3127_v15, %s3309_s25  ;;  %v3666_v24 = vsel %vm534_vm0, %v1064_v1, %v1065_v16  ;;  %v1094_v53 = vsel %vm583_vm1, %v1088_v44, %v1089_v41  ;;  %1245 = vmatpush.bf16.msrb.mxu0 %v2907_v9 }
  0xf0   : > { %v1001_v23 = vadd.f32 %v1000_v14, %v972_v17  ;;  %v1081_v26 = vsel %vm3656_vm11, 0.0, %v3666_v24  ;;  %v946_v29 = vadd.f32 %v945_v25, %v917_v21  ;;  %v1104_v61 = vsel %vm3683_vm14, 0.0, %v1094_v53  ;;  %v2905_v25 = vld [vmem:[%s3891_s3] sm:$0xff]  ;;  %1476 = vmatpush.bf16.msrb.mxu2 %v2928_v7 }
  0xf2   : > { %vm1013_vm12 = vcmp.gt.f32.partialorder %v1001_v23, 0.0  ;;  %v1021_v27 = vmul.f32 0.2, %v1001_v23 }
  0xf4   : > { %v1029_v30 = vsel %vm1013_vm12, %v1001_v23, %v1021_v27 }
  0xf5   : > { %1038 = vst.msk [vmem:[#allocation3 + $0x28] sm:$0xff] %vm1032_vm6, %v1029_v30  ;;  %v974_v31 = vpop.f32.mrf.mxu2  ;;  %v918_v35 = vpop.f32.mrf.mxu0 }
  0xf6   : > { %v1003_v32 = vpop.f32.mrf.mxu3  ;;  %v975_v34 = vadd.f32 %v974_v31, %v946_v29  ;;  %v919_v38 = vadd.f32 %v3636_v49, %v918_v35  ;;  %v947_v45 = vpop.f32.mrf.mxu1 }
  0xf7   : > { %3133 = vrot.lane.b32.xlu0 %v3132_v33, %s3310_s29 }
  0xf8   : > { %v1004_v37 = vadd.f32 %v1003_v32, %v975_v34  ;;  %v948_v47 = vadd.f32 %v947_v45, %v919_v38 }
  0xfa   : > { %vm1014_vm13 = vcmp.gt.f32.partialorder %v1004_v37, 0.0  ;;  %v1022_v43 = vmul.f32 0.2, %v1004_v37 }
  0xfc   : > { %v1030_v46 = vsel %vm1014_vm13, %v1004_v37, %v1022_v43  ;;  %v1045_v48 = vld [vmem:[#allocation3 + $0x20] ss:$2 sm:$0xff]  ;;  %v1053_v49 = vld [vmem:[#allocation3 + $0x21] ss:$2 sm:$0xff] }
  0xfd   : > { %1039 = vst.msk [vmem:[#allocation3 + $0x30] sm:$0xff] %vm1032_vm6, %v1030_v46  ;;  %v976_v51 = vpop.f32.mrf.mxu2  ;;  %v1090_v52 = vrot.slane %v1045_v48, 1  ;;  %v1066_v54 = vrot.slane %v1053_v49, 7 }
  0xfe   : > { %v977_v56 = vadd.f32 %v976_v51, %v948_v47  ;;  %v1005_v57 = vpop.f32.mrf.mxu3 }
  0xff   : > { %v1093_v58 = vsel %vm583_vm1, %v1089_v41, %v1090_v52  ;;  %v3697_v59 = vsel %vm534_vm0, %v1065_v16, %v1066_v54 }
 0x100   : > { %v1006_v60 = vadd.f32 %v1005_v57, %v977_v56  ;;  %v1105_v63 = vsel %vm1085_vm15, 0.0, %v1093_v58  ;;  %v1082_v50 = vsel %vm1062_vm9, 0.0, %v3697_v59  ;;  %v3168_v59 = vld [vmem:[%s3892_s4] ss:$0 sm:$0xff] }
 0x101   : > { %v3137_v0 = vpack.i.bf16 %v1105_v63, %v1104_v61 }
 0x102   : > { %vm1015_vm2 = vcmp.gt.f32.partialorder %v1006_v60, 0.0  ;;  %v1023_v3 = vmul.f32 0.2, %v1006_v60 }
 0x103   : > { %3138 = vrot.lane.b32.xlu1 %v3137_v0, %s3311_s16 }
 0x104   : > { %v1031_v5 = vsel %vm1015_vm2, %v1006_v60, %v1023_v3 }
 0x105   : > { %1040 = vst.msk [vmem:[#allocation3 + $0x38] sm:$0xff] %vm1032_vm6, %v1031_v5 }
 0x10c   : > { %v1055_v11 = vld [vmem:[#allocation3 + $0x31] ss:$2 sm:$0xff]  ;;  %v1047_v12 = vld [vmem:[#allocation3 + $0x30] ss:$2 sm:$0xff] }
 0x10d   : > { %v1067_v13 = vrot.slane %v1055_v11, 7  ;;  %v3147_v4 = vpack.i.bf16 %v1055_v11, %v1053_v49  ;;  %v1091_v62 = vrot.slane %v1047_v12, 1  ;;  %v3142_v14 = vpack.i.bf16 %v1047_v12, %v1045_v48  ;;  %v2927_v11 = vld [vmem:[%s3893_s5 + $0x70] sm:$0xff] }
 0x10e   : > { %v2919_v12 = vld [vmem:[%s3893_s5 + $0x30] sm:$0xff]  ;;  %1477 = vmatpush.bf16.msrb.mxu2 %v2927_v11 }
 0x10f   : > { %3148 = vrot.lane.b32.xlu2 %v3147_v4, %s3310_s29  ;;  %v1068_v15 = vsel %vm534_vm0, %v1066_v54, %v1067_v13  ;;  %v1071_v19 = vsel %vm534_vm0, %v1067_v13, %v1064_v1  ;;  %3143 = vrot.lane.b32.xlu1 %v3142_v14, %s3309_s25  ;;  %v1092_v22 = vsel %vm583_vm1, %v1090_v52, %v1091_v62  ;;  %v2906_v1 = vld [vmem:[%s3891_s3 + $0x8] sm:$0xff] }
 0x110   : > { %v1095_v16 = vsel %vm583_vm1, %v1091_v62, %v1088_v44  ;;  %v1080_v17 = vsel %vm3710_vm3, 0.0, %v1071_v19  ;;  %v1106_v18 = vsel %vm1086_vm5, 0.0, %v1092_v22  ;;  %1246 = vmatpush.bf16.msrb.mxu0 %v2906_v1  ;;  %v1083_v49 = vsel %vm1063_vm10, 0.0, %v1068_v15  ;;  %1463 = vmatpush.bf16.msrb.mxu1 %v2919_v12  ;;  %v2926_v62 = vld [vmem:[%s3893_s5 + $0x68] sm:$0xff]  ;;  %v2925_v22 = vld [vmem:[%s3893_s5 + $0x60] sm:$0xff] }
 0x111   : > { %v1107_v21 = vsel %vm1087_vm4, 0.0, %v1095_v16  ;;  %v2918_v14 = vld [vmem:[%s3893_s5 + $0x28] sm:$0xff]  ;;  %v2917_v16 = vld [vmem:[%s3893_s5 + $0x20] sm:$0xff] }
 0x112   : > { %v3152_v23 = vpack.i.bf16 %v1107_v21, %v1106_v18  ;;  %1478 = vmatpush.bf16.msrb.mxu2 %v2926_v62  ;;  %v2924_v21 = vld [vmem:[%s3893_s5 + $0x58] sm:$0xff] }
 0x114   : > { %1247 = vmatpush.bf16.msrb.mxu0 %v2905_v25  ;;  %1464 = vmatpush.bf16.msrb.mxu1 %v2918_v14  ;;  %v2923_v25 = vld [vmem:[%s3893_s5 + $0x50] sm:$0xff] }
 0x116   : > { %1479 = vmatpush.bf16.msrb.mxu2 %v2925_v22 }
 0x117   : > { %3153 = vrot.lane.b32.xlu2 %v3152_v23, %s3311_s16  ;;  %v2916_v23 = vld [vmem:[%s3893_s5 + $0x18] sm:$0xff] }
 0x118   : > { %1465 = vmatpush.bf16.msrb.mxu1 %v2917_v16 }
 0x11a   : > { %1480 = vmatpush.bf16.msrb.mxu2 %v2924_v21  ;;  %v2934_v21 = vld [vmem:[#allocation5 + $0x24] sm:$0xf0] }
 0x11c   : > { %1466 = vmatpush.bf16.msrb.mxu1 %v2916_v23  ;;  %v2939_v23 = vld [vmem:[#allocation5 + $0x54] sm:$0xf] }
 0x11e   : > { %1481 = vmatpush.bf16.msrb.mxu2 %v2923_v25  ;;  %v2937_v25 = vld [vmem:[#allocation5 + $0x44] sm:$0xf] }
 0x161   : > { %v3129_v27 = vpop.permute.xlu0 %3128 }
 0x162   : > { %v3131_v30 = vunpack.i.h.bf16 %v3129_v27  ;;  %v3130_v31 = vunpack.i.l.bf16 %v3129_v27  ;;  %v2915_v27 = vld [vmem:[%s3893_s5 + $0x10] sm:$0xff] }
 0x163   : > { %1467 = vmatpush.bf16.msrb.mxu1 %v2915_v27  ;;  %v2583_v27 = vld [vmem:[#allocation5 + $0x48] sm:$0xf0] }
 0x164   : > { %v1157_v35 = vsel %vm1032_vm6, %v1081_v26, %v3131_v30  ;;  %v1156_v36 = vsel %vm1032_vm6, %v1080_v17, %v3130_v31  ;;  %v1283_v30 = vand.u32 3, %v3527_v39  ;;  %v2922_v31 = vld [vmem:[%s3893_s5 + $0x48] sm:$0xff] }
 0x165   : > { %1482 = vmatpush.bf16.msrb.mxu2 %v2922_v31  ;;  %v2935_v31 = vld [vmem:[#allocation5 + $0x34] sm:$0xf] }
 0x166   : > { %vm1297_vm15 = vcmp.eq.s32.totalorder %v1283_v30, 3  ;;  %vm1285_vm2 = vcmp.eq.s32.totalorder %v1283_v30, 0  ;;  %v2586_v30 = vor.u32 %v2937_v25, %v2583_v27  ;;  %v2963_v27 = vld [vmem:[#allocation8 + $0x8c] sm:$0xf0] }
 0x169   : > { %v3134_v29 = vpop.permute.xlu0 %3133  ;;  %v3149_v40 = vpop.permute.xlu2 %3148 }
 0x16a   : > { %v3136_v32 = vunpack.i.h.bf16 %v3134_v29  ;;  %v3135_v33 = vunpack.i.l.bf16 %v3134_v29  ;;  %v3151_v47 = vunpack.i.h.bf16 %v3149_v40  ;;  %v3150_v48 = vunpack.i.l.bf16 %v3149_v40 }
 0x16b   : > { %v1282_v29 = vand.u32 3, %v3510_v28 }
 0x16c   : > { %v1161_v41 = vsel %vm1160_vm7, %v1156_v36, %v3135_v33  ;;  %v1162_v42 = vsel %vm1160_vm7, %v1157_v35, %v3136_v32  ;;  %v2914_v32 = vld [vmem:[%s3893_s5 + $0x8] sm:$0xff] }
 0x16d   : > { %vm1296_vm14 = vcmp.eq.s32.totalorder %v1282_v29, 3  ;;  %1468 = vmatpush.bf16.msrb.mxu1 %v2914_v32  ;;  %v2575_v32 = vld [vmem:[#allocation5 + $0x38] sm:$0xf0] }
 0x171   : > { %v3154_v20 = vpop.permute.xlu2 %3153 }
 0x172   : > { %v3156_v51 = vunpack.i.h.bf16 %v3154_v20  ;;  %v3155_v52 = vunpack.i.l.bf16 %v3154_v20  ;;  %v2944_v20 = vld [vmem:[#allocation5 + $0x74] sm:$0xf0] }
 0x175   : > { %v3139_v34 = vpop.permute.xlu1 %3138 }
 0x176   : > { %v3141_v37 = vunpack.i.h.bf16 %v3139_v34  ;;  %v3140_v38 = vunpack.i.l.bf16 %v3139_v34 }
 0x178   : > { %v1166_v43 = vsel %vm1165_vm8, %v1161_v41, %v3140_v38  ;;  %v1167_v44 = vsel %vm1165_vm8, %v1162_v42, %v3141_v37 }
 0x179   : > { %v1170_v45 = vpack.c.bf16 %v1167_v44, %v1166_v43  ;;  %v2921_v43 = vld [vmem:[%s3893_s5 + $0x40] sm:$0xff] }
 0x17a   : > { %v2913_v44 = vld [vmem:[%s3893_s5] sm:$0xff]  ;;  %1483 = vmatpush.bf16.msrb.mxu2 %v2921_v43 }
 0x17b   : > { %1248 = vmatmul.bf16.vlgmr.msrb.gmra.mxu0 %v1170_v45  ;;  %1469 = vmatpush.bf16.msrb.mxu1 %v2913_v44  ;;  %v2605_v45 = vld [vmem:[#allocation5 + $0x70] sm:$0xf]  ;;  %v2549_v43 = vld [vmem:[#allocation5] sm:$0xf]  ;;  %v2930_v44 = vld [vmem:[#allocation5 + $0x4] sm:$0xf0] }
 0x181   : > { %v3144_v24 = vpop.permute.xlu1 %3143 }
 0x182   : > { %v3146_v26 = vunpack.i.h.bf16 %v3144_v24  ;;  %v3145_v46 = vunpack.i.l.bf16 %v3144_v24  ;;  %v2597_v24 = vld [vmem:[#allocation5 + $0x60] sm:$0xf] }
 0x184   : > { %v1159_v53 = vsel %vm1032_vm6, %v1083_v49, %v3146_v26  ;;  %v1158_v54 = vsel %vm1032_vm6, %v1082_v50, %v3145_v46  ;;  %v2606_v26 = vor.u32 %v2944_v20, %v2605_v45  ;;  %v2942_v46 = vld [vmem:[#allocation5 + $0x64] sm:$0xf0]  ;;  %v2943_v50 = vld [vmem:[#allocation5 + $0x74] sm:$0xf]  ;;  %v2607_v49 = vld [vmem:[#allocation5 + $0x78] sm:$0xf0]  ;;  %v2550_v20 = vor.u32 %v2930_v44, %v2549_v43 }
 0x185   : > { %v1163_v55 = vsel %vm1160_vm7, %v1158_v54, %v3150_v48  ;;  %v1164_v56 = vsel %vm1160_vm7, %v1159_v53, %v3151_v47  ;;  %v2598_v47 = vor.u32 %v2942_v46, %v2597_v24  ;;  %v2589_v48 = vld [vmem:[#allocation5 + $0x50] sm:$0xf]  ;;  %v2941_v53 = vld [vmem:[#allocation5 + $0x64] sm:$0xf]  ;;  %v2599_v54 = vld [vmem:[#allocation5 + $0x68] sm:$0xf0] }
 0x186   : > { %v1168_v57 = vsel %vm1165_vm8, %v1163_v55, %v3155_v52  ;;  %v1169_v58 = vsel %vm1165_vm8, %v1164_v56, %v3156_v51  ;;  %1599 = vmatpush.bf16.msrb.mxu3 %v2606_v26  ;;  %v2940_v51 = vld [vmem:[#allocation5 + $0x54] sm:$0xf0]  ;;  %v2610_v52 = vor.u32 %v2943_v50, %v2607_v49  ;;  %v2602_v55 = vor.u32 %v2941_v53, %v2599_v54  ;;  %v2929_v45 = vld [vmem:[#allocation5 + $0x4] sm:$0xf]  ;;  %v2551_v24 = vld [vmem:[#allocation5 + $0x8] sm:$0xf0] }
 0x187   : > { %v1171_v60 = vpack.c.bf16 %v1169_v58, %v1168_v57  ;;  %v2590_v56 = vor.u32 %v2940_v51, %v2589_v48  ;;  %v2581_v57 = vld [vmem:[#allocation5 + $0x40] sm:$0xf]  ;;  %v2938_v58 = vld [vmem:[#allocation5 + $0x44] sm:$0xf0]  ;;  %v2554_v26 = vor.u32 %v2929_v45, %v2551_v24  ;;  %v3005_v48 = vld [vmem:[#allocation8 + $0x1e4] sm:$0xf] }
 0x188   : > { %1613 = vmatpush.bf16.msra.mxu0 %v2610_v52  ;;  %v2853_v46 = vld [vmem:[#allocation8 + $0x1e0] sm:$0xf]  ;;  %v2855_v49 = vld [vmem:[#allocation8 + $0x1f0] sm:$0xf0]  ;;  %v3003_v52 = vld [vmem:[#allocation8 + $0x1cc] sm:$0xf0] }
 0x189   : > { %v2837_v51 = vld [vmem:[#allocation8 + $0x1c0] sm:$0xf]  ;;  %v2858_v53 = vor.u32 %v3005_v48, %v2855_v49  ;;  %v3001_v54 = vld [vmem:[#allocation8 + $0x1c4] sm:$0xf]  ;;  %v2663_v43 = vld [vmem:[#allocation8 + $0x70] sm:$0xf0] }
 0x18a   : > { %1600 = vmatpush.bf16.msrb.mxu3 %v2598_v47  ;;  %v3007_v47 = vld [vmem:[#allocation8 + $0x1ec] sm:$0xf0] }
 0x18b   : > { %1253 = vmatmul.bf16.gmra.mxu0 %v1171_v60  ;;  %v2582_v60 = vor.u32 %v2938_v58, %v2581_v57  ;;  %v2854_v50 = vor.u32 %v3007_v47, %v2853_v46  ;;  %v2838_v57 = vor.u32 %v3003_v52, %v2837_v51  ;;  %v2975_v58 = vld [vmem:[#allocation8 + $0xec] sm:$0xf0]  ;;  %v2775_v46 = vld [vmem:[#allocation8 + $0x150] sm:$0xf0] }
 0x18c   : > { %1614 = vmatpush.bf16.msra.mxu0 %v2602_v55  ;;  %v2839_v55 = vld [vmem:[#allocation8 + $0x1d0] sm:$0xf0]  ;;  %v2987_v24 = vld [vmem:[#allocation8 + $0x14c] sm:$0xf0] }
 0x18d   : > { %2049 = vmatpush.bf16.msra.mxu2 %v2854_v50  ;;  %v2645_v50 = vld [vmem:[#allocation8 + $0x40] sm:$0xf]  ;;  %v2955_v52 = vld [vmem:[#allocation8 + $0x4c] sm:$0xf0] }
 0x18e   : > { %1601 = vmatpush.bf16.msrb.mxu3 %v2590_v56  ;;  %v2725_v56 = vld [vmem:[#allocation8 + $0xe0] sm:$0xf] }
 0x191   : > { %2050 = vmatpush.bf16.msra.mxu2 %v2838_v57  ;;  %v2757_v57 = vld [vmem:[#allocation8 + $0x120] sm:$0xf] }
 0x192   : > { %1602 = vmatpush.bf16.msrb.mxu3 %v2582_v60  ;;  %v2973_v60 = vld [vmem:[#allocation8 + $0xe4] sm:$0xf] }
 0x1f8   : > { %v1249_v61 = vpop.f32.mrf.mxu0 }
 0x1f9   : > { %v1250_v63 = vadd.f32 %v3168_v59, %v1249_v61  ;;  %v2936_v61 = vld [vmem:[#allocation5 + $0x34] sm:$0xf0] }
 0x1fb   : > { %vm1259_vm11 = vcmp.gt.f32.partialorder %v1250_v63, 0.0  ;;  %v1263_v0 = vmul.f32 0.2, %v1250_v63 }
 0x1fd   : > { %v1267_v2 = vsel %vm1259_vm11, %v1250_v63, %v1263_v0 }
 0x1fe   : > { %1271 = vst.msk [vmem:[#allocation4] sm:$0xff] %vm1160_vm7, %v1267_v2 }
 0x200   : > { %v1251_v3 = vpop.f32.mrf.mxu0 }
 0x201   : > { %v1252_v5 = vadd.f32 %v3168_v59, %v1251_v3 }
 0x203   : > { %vm1260_vm6 = vcmp.gt.f32.partialorder %v1252_v5, 0.0  ;;  %v1264_v6 = vmul.f32 0.2, %v1252_v5 }
 0x205   : > { %v1268_v10 = vsel %vm1260_vm6, %v1252_v5, %v1264_v6 }
 0x206   : > { %1272 = vst.msk [vmem:[#allocation4 + $0x8] sm:$0xff] %vm1160_vm7, %v1268_v10 }
 0x208   : > { %v1254_v13 = vpop.f32.mrf.mxu0 }
 0x209   : > { %v1255_v4 = vadd.f32 %v3168_v59, %v1254_v13 }
 0x20b   : > { %vm1261_vm12 = vcmp.gt.f32.partialorder %v1255_v4, 0.0  ;;  %v1265_v15 = vmul.f32 0.2, %v1255_v4 }
 0x20d   : > { %v1269_v19 = vsel %vm1261_vm12, %v1255_v4, %v1265_v15  ;;  %v1275_v33 = vld [vmem:[#allocation4] ss:$2 sm:$0xff]  ;;  %v1279_v2 = vld [vmem:[#allocation4 + $0x1] ss:$2 sm:$0xff] }
 0x20e   : > { %1273 = vst.msk [vmem:[#allocation4 + $0x10] sm:$0xff] %vm1160_vm7, %v1269_v19  ;;  %v1298_v37 = vrot.slane %v1275_v33, 1  ;;  %v1286_v5 = vrot.slane %v1279_v2, 7 }
 0x210   : > { %v1256_v17 = vpop.f32.mrf.mxu0 }
 0x211   : > { %v1257_v18 = vadd.f32 %v3168_v59, %v1256_v17  ;;  %v2573_v59 = vld [vmem:[#allocation5 + $0x30] sm:$0xf] }
 0x212   : > { %v2574_v0 = vor.u32 %v2936_v61, %v2573_v59  ;;  %v2727_v59 = vld [vmem:[#allocation8 + $0xf0] sm:$0xf0]  ;;  %v2842_v61 = vor.u32 %v3001_v54, %v2839_v55 }
 0x213   : > { %vm1262_vm13 = vcmp.gt.f32.partialorder %v1257_v18, 0.0  ;;  %v1266_v9 = vmul.f32 0.2, %v1257_v18  ;;  %v2647_v54 = vld [vmem:[#allocation8 + $0x50] sm:$0xf0] }
 0x214   : > { %1603 = vmatpush.bf16.msrb.mxu3 %v2574_v0  ;;  %v2730_v0 = vor.u32 %v2973_v60, %v2727_v59  ;;  %v2981_v59 = vld [vmem:[#allocation8 + $0x124] sm:$0xf] }
 0x215   : > { %v1270_v1 = vsel %vm1262_vm13, %v1257_v18, %v1266_v9  ;;  %v2565_v18 = vld [vmem:[#allocation5 + $0x20] sm:$0xf] }
 0x216   : > { %1274 = vst.msk [vmem:[#allocation4 + $0x18] sm:$0xff] %vm1160_vm7, %v1270_v1  ;;  %v2566_v9 = vor.u32 %v2934_v21, %v2565_v18  ;;  %v2591_v1 = vld [vmem:[#allocation5 + $0x58] sm:$0xf0]  ;;  %v2695_v18 = vld [vmem:[#allocation8 + $0xb0] sm:$0xf0] }
 0x218   : > { %1604 = vmatpush.bf16.msrb.mxu3 %v2566_v9 }
 0x21d   : > { %v1277_v34 = vld [vmem:[#allocation4 + $0x10] ss:$2 sm:$0xff]  ;;  %v1281_v63 = vld [vmem:[#allocation4 + $0x11] ss:$2 sm:$0xff] }
 0x21e   : > { %v1299_v35 = vrot.slane %v1277_v34, 1  ;;  %v3162_v36 = vpack.i.bf16 %v1277_v34, %v1275_v33  ;;  %v1287_v3 = vrot.slane %v1281_v63, 7  ;;  %v2578_v33 = vor.u32 %v2935_v31, %v2575_v32  ;;  %v2557_v34 = vld [vmem:[#allocation5 + $0x10] sm:$0xf]  ;;  %v2789_v32 = vld [vmem:[#allocation8 + $0x160] sm:$0xf] }
 0x220   : > { %3163 = vrot.lane.b32.xlu1 %v3162_v36, %s3310_s29  ;;  %v1300_v39 = vsel %vm583_vm1, %v1298_v37, %v1299_v35  ;;  %v1301_v38 = vsel %vm583_vm1, %v1299_v35, %v1298_v37  ;;  %vm1284_vm1 = vcmp.eq.s32.totalorder %v1282_v29, 0  ;;  %v1288_v6 = vsel %vm534_vm0, %v1286_v5, %v1287_v3  ;;  %v2932_v35 = vld [vmem:[#allocation5 + $0x14] sm:$0xf0]  ;;  %v2933_v36 = vld [vmem:[#allocation5 + $0x24] sm:$0xf] }
 0x221   : > { %v1306_v40 = vsel %vm1296_vm14, 0.0, %v1300_v39  ;;  %v1307_v41 = vsel %vm1297_vm15, 0.0, %v1301_v38  ;;  %v1289_v7 = vsel %vm534_vm0, %v1287_v3, %v1286_v5  ;;  %v1295_v13 = vsel %vm1285_vm2, 0.0, %v1288_v6  ;;  %v2567_v39 = vld [vmem:[#allocation5 + $0x28] sm:$0xf0] }
 0x222   : > { %v3157_v42 = vpack.i.bf16 %v1307_v41, %v1306_v40  ;;  %v1294_v12 = vsel %vm1284_vm1, 0.0, %v1289_v7  ;;  %v2594_v29 = vor.u32 %v2939_v23, %v2591_v1  ;;  %v2558_v37 = vor.u32 %v2932_v35, %v2557_v34  ;;  %v2931_v40 = vld [vmem:[#allocation5 + $0x14] sm:$0xf]  ;;  %v2559_v41 = vld [vmem:[#allocation5 + $0x18] sm:$0xf0] }
 0x223   : > { %v2570_v38 = vor.u32 %v2933_v36, %v2567_v39  ;;  %v2999_v3 = vld [vmem:[#allocation8 + $0x1ac] sm:$0xf0]  ;;  %v2997_v5 = vld [vmem:[#allocation8 + $0x1a4] sm:$0xf]  ;;  %v2823_v6 = vld [vmem:[#allocation8 + $0x1b0] sm:$0xf0] }
 0x224   : > { %3158 = vrot.lane.b32.xlu0 %v3157_v42, %s3310_s29  ;;  %1615 = vmatpush.bf16.msra.mxu0 %v2594_v29  ;;  %v2562_v42 = vor.u32 %v2931_v40, %v2559_v41  ;;  %v2709_v7 = vld [vmem:[#allocation8 + $0xc0] sm:$0xf]  ;;  %v2961_v29 = vld [vmem:[#allocation8 + $0x84] sm:$0xf]  ;;  %v2791_v35 = vld [vmem:[#allocation8 + $0x170] sm:$0xf0]  ;;  %s2192_s29 = scalar_lea.hbm %s3899_s11, %s3010_s19 }
 0x225   : > { %1605 = vmatpush.bf16.msrb.mxu3 %v2558_v37  ;;  %v2677_v1 = vld [vmem:[#allocation8 + $0x80] sm:$0xf]  ;;  %v2989_v34 = vld [vmem:[#allocation8 + $0x164] sm:$0xf]  ;;  %v2959_v41 = vld [vmem:[#allocation8 + $0x6c] sm:$0xf0] }
 0x226   : > { %v3169_v36 = vld [vmem:[%s3894_s6] ss:$0 sm:$0xff]  ;;  %v2678_v37 = vor.u32 %v2963_v27, %v2677_v1  ;;  %v2794_v45 = vor.u32 %v2989_v34, %v2791_v35  ;;  %v2951_v1 = vld [vmem:[#allocation8 + $0x2c] sm:$0xf0]  ;;  %v2631_v27 = vld [vmem:[#allocation8 + $0x30] sm:$0xf0] }
 0x227   : > { %v2847_v35 = vld [vmem:[#allocation8 + $0x1d8] sm:$0xf0]  ;;  %s2195_s16 = sshll.u32 %s2192_s29, 4  ;;  %s3250_s19 = scalar_lea.hbm %s3899_s11, 192  ;;  %s2196_s16 = int_to_ptr.hbm [resolvable:$true] %s2195_s16 }
 0x228   : > { %1616 = vmatpush.bf16.msra.mxu0 %v2586_v30  ;;  %v2679_v30 = vld [vmem:[#allocation8 + $0x90] sm:$0xf0]  ;;  %s3244_s22 = sshra.s32 %s2196_s16, 4  ;;  %s3245_s22 = int_to_ptr.hbm [resolvable:$true] %s3244_s22 }
 0x229   : > { %1606 = vmatpush.bf16.msrb.mxu3 %v2550_v20  ;;  %v2682_v39 = vor.u32 %v2961_v29, %v2679_v30  ;;  %v2773_v20 = vld [vmem:[#allocation8 + $0x140] sm:$0xf]  ;;  %s3246_s24 = scalar_lea.hbm %s3245_s22, 64  ;;  %p3251_p3 = scmp.lt.s32.totalorder %s3245_s22, %s3899_s11 }
 0x22a   : > { %v2774_v51 = vor.u32 %v2987_v24, %v2773_v20  ;;  %v2735_v24 = vld [vmem:[#allocation8 + $0xf8] sm:$0xf0]  ;;  %p3247_p0 = scmp.ne.s32.totalorder %s3245_s22, %s3246_s24  ;;  %p3252_p4 = scmp.lt.s32.totalorder %s3250_s19, %s3246_s24 }
 0x22c   : > { %1617 = vmatpush.bf16.msra.mxu0 %v2578_v33  ;;  %v2991_v33 = vld [vmem:[#allocation8 + $0x16c] sm:$0xf0]  ;;  %p3248_p1 = pnand %p3247_p0, %p3411_p5  ;;  %p3253_p7 = por %p3252_p4, %p3251_p3 }
 0x22d   : > { %2063 = vmatpush.bf16.msra.mxu3 %v2730_v0  ;;  %v2790_v40 = vor.u32 %v2991_v33, %v2789_v32  ;;  %v3004_v32 = vld [vmem:[#allocation8 + $0x1d4] sm:$0xf0]  ;;  %v3002_v33 = vld [vmem:[#allocation8 + $0x1cc] sm:$0xf] }
 0x22e   : > { %p3249_p2 = pneg %p3248_p1 }
 0x230   : > { %1618 = vmatpush.bf16.msra.mxu0 %v2570_v38  ;;  %v2661_v38 = vld [vmem:[#allocation8 + $0x60] sm:$0xf]  ;;  %p3254_p8 = pnand %p3253_p7, %p3249_p2 }
 0x231   : > { %v2662_v47 = vor.u32 %v2959_v41, %v2661_v38  ;;  %v2615_v41 = vld [vmem:[#allocation8 + $0x10] sm:$0xf0] }
 0x234   : > { %1619 = vmatpush.bf16.msra.mxu0 %v2562_v42  ;;  %v2957_v42 = vld [vmem:[#allocation8 + $0x64] sm:$0xf] }
 0x235   : > { %v2666_v48 = vor.u32 %v2957_v42, %v2663_v43  ;;  %v2733_v43 = vld [vmem:[#allocation8 + $0xe8] sm:$0xf] }
 0x238   : > { %1620 = vmatpush.bf16.msra.mxu0 %v2554_v26  ;;  %v2985_v26 = vld [vmem:[#allocation8 + $0x144] sm:$0xf] }
 0x23c   : > { %2077 = vmatpush.bf16.msrb.mxu0 %v2858_v53  ;;  %v2953_v53 = vld [vmem:[#allocation8 + $0x44] sm:$0xf] }
 0x23d   : > { %v2650_v0 = vor.u32 %v2953_v53, %v2647_v54  ;;  %v2972_v53 = vld [vmem:[#allocation8 + $0xd4] sm:$0xf0]  ;;  %v2970_v54 = vld [vmem:[#allocation8 + $0xcc] sm:$0xf] }
 0x240   : > { %2078 = vmatpush.bf16.msrb.mxu0 %v2842_v61  ;;  %v2759_v61 = vld [vmem:[#allocation8 + $0x130] sm:$0xf0] }
 0x292   : > { %v3164_v8 = vpop.permute.xlu1 %3163 }
 0x293   : > { %v3166_v10 = vunpack.i.h.bf16 %v3164_v8  ;;  %v3165_v11 = vunpack.i.l.bf16 %v3164_v8  ;;  %v2971_v8 = vld [vmem:[#allocation8 + $0xcc] sm:$0xf0] }
 0x295   : > { %v1324_v4 = vsel %vm1160_vm7, %v1294_v12, %v3165_v11  ;;  %v1325_v62 = vsel %vm1160_vm7, %v1295_v13, %v3166_v10  ;;  %v2710_v10 = vor.u32 %v2971_v8, %v2709_v7  ;;  %v2969_v11 = vld [vmem:[#allocation8 + $0xc4] sm:$0xf]  ;;  %v2711_v12 = vld [vmem:[#allocation8 + $0xd0] sm:$0xf0] }
 0x296   : > { %v3159_v14 = vpop.permute.xlu0 %3158  ;;  %v1328_v15 = vpack.c.bf16 %v1325_v62, %v1324_v4  ;;  %v2714_v4 = vor.u32 %v2969_v11, %v2711_v12  ;;  %v2805_v62 = vld [vmem:[#allocation8 + $0x180] sm:$0xf] }
 0x297   : > { %v3161_v19 = vunpack.i.h.bf16 %v3159_v14  ;;  %v3160_v22 = vunpack.i.l.bf16 %v3159_v14  ;;  %v2995_v14 = vld [vmem:[#allocation8 + $0x18c] sm:$0xf0] }
 0x298   : > { %1470 = vmatmul.bf16.vlgmr.msrb.gmra.mxu1 %v1328_v15  ;;  %v2826_v15 = vor.u32 %v2997_v5, %v2823_v6  ;;  %2064 = vmatpush.bf16.msra.mxu3 %v2714_v4  ;;  %v2806_v25 = vor.u32 %v2995_v14, %v2805_v62  ;;  %v2762_v6 = vor.u32 %v2981_v59, %v2759_v61  ;;  %v2741_v4 = vld [vmem:[#allocation8 + $0x100] sm:$0xf]  ;;  %v2979_v62 = vld [vmem:[#allocation8 + $0x10c] sm:$0xf0]  ;;  %v2977_v14 = vld [vmem:[#allocation8 + $0x104] sm:$0xf] }
 0x299   : > { %v1326_v16 = vsel %vm1160_vm7, %v1279_v2, %v3160_v22  ;;  %v1327_v17 = vsel %vm1160_vm7, %v1281_v63, %v3161_v19  ;;  %v2726_v63 = vor.u32 %v2975_v58, %v2725_v56  ;;  %v2821_v2 = vld [vmem:[#allocation8 + $0x1a0] sm:$0xf]  ;;  %v2967_v22 = vld [vmem:[#allocation8 + $0xac] sm:$0xf0]  ;;  %v2778_v56 = vor.u32 %v2985_v26, %v2775_v46  ;;  %v2829_v26 = vld [vmem:[#allocation8 + $0x1a8] sm:$0xf] }
 0x29a   : > { %v1329_v28 = vpack.c.bf16 %v1327_v17, %v1326_v16  ;;  %v2822_v13 = vor.u32 %v2999_v3, %v2821_v2  ;;  %v2693_v19 = vld [vmem:[#allocation8 + $0xa0] sm:$0xf]  ;;  %v2965_v16 = vld [vmem:[#allocation8 + $0xa4] sm:$0xf]  ;;  %2079 = vmatpush.bf16.msrb.mxu0 %v2826_v15  ;;  %v2983_v58 = vld [vmem:[#allocation8 + $0x12c] sm:$0xf0]  ;;  %v2742_v15 = vor.u32 %v2979_v62, %v2741_v4 }
 0x29b   : > { %2035 = vmatpush.bf16.msra.mxu1 %v2726_v63  ;;  %v2993_v17 = vld [vmem:[#allocation8 + $0x184] sm:$0xf]  ;;  %v2694_v23 = vor.u32 %v2967_v22, %v2693_v19  ;;  %v2698_v9 = vor.u32 %v2965_v16, %v2695_v18  ;;  %v2646_v63 = vor.u32 %v2955_v52, %v2645_v50  ;;  %v2758_v3 = vor.u32 %v2983_v58, %v2757_v57  ;;  %v2743_v19 = vld [vmem:[#allocation8 + $0x110] sm:$0xf0]  ;;  %v2861_v22 = vld [vmem:[#allocation8 + $0x1e8] sm:$0xf] }
 0x29c   : > { %1484 = vmatmul.bf16.vlgmr.msrb.gmra.mxu2 %v1329_v28  ;;  %v2807_v28 = vld [vmem:[#allocation8 + $0x190] sm:$0xf0]  ;;  %v3008_v16 = vld [vmem:[#allocation8 + $0x1f4] sm:$0xf0]  ;;  %v3006_v18 = vld [vmem:[#allocation8 + $0x1ec] sm:$0xf] }
 0x29d   : > { %2051 = vmatpush.bf16.msra.mxu2 %v2822_v13  ;;  %v2810_v31 = vor.u32 %v2993_v17, %v2807_v28  ;;  %2065 = vmatpush.bf16.msra.mxu3 %v2698_v9  ;;  %v2746_v17 = vor.u32 %v2977_v14, %v2743_v19  ;;  %v2862_v28 = vor.u32 %v3008_v16, %v2861_v22  ;;  %v3000_v46 = vld [vmem:[#allocation8 + $0x1b4] sm:$0xf0]  ;;  %v2998_v50 = vld [vmem:[#allocation8 + $0x1ac] sm:$0xf]  ;;  %v2717_v52 = vld [vmem:[#allocation8 + $0xc8] sm:$0xf] }
 0x29e   : > { %v2813_v58 = vld [vmem:[#allocation8 + $0x188] sm:$0xf]  ;;  %v2994_v59 = vld [vmem:[#allocation8 + $0x18c] sm:$0xf]  ;;  %v2799_v4 = vld [vmem:[#allocation8 + $0x178] sm:$0xf0] }
 0x29f   : > { %2036 = vmatpush.bf16.msra.mxu1 %v2710_v10  ;;  %2080 = vmatpush.bf16.msrb.mxu0 %v2810_v31  ;;  %v2845_v31 = vld [vmem:[#allocation8 + $0x1c8] sm:$0xf]  ;;  %v2962_v19 = vld [vmem:[#allocation8 + $0x8c] sm:$0xf]  ;;  %v2687_v16 = vld [vmem:[#allocation8 + $0x98] sm:$0xf0] }
 0x2a0   : > { %v2846_v34 = vor.u32 %v3004_v32, %v2845_v31  ;;  %v2685_v14 = vld [vmem:[#allocation8 + $0x88] sm:$0xf]  ;;  %v2671_v31 = vld [vmem:[#allocation8 + $0x78] sm:$0xf0] }
 0x2a1   : > { %2052 = vmatpush.bf16.msra.mxu2 %v2806_v25  ;;  %2066 = vmatpush.bf16.msra.mxu3 %v2682_v39  ;;  %v2949_v25 = vld [vmem:[#allocation8 + $0x24] sm:$0xf]  ;;  %v2850_v39 = vor.u32 %v3002_v33, %v2847_v35  ;;  %v2765_v32 = vld [vmem:[#allocation8 + $0x128] sm:$0xf]  ;;  %v2984_v33 = vld [vmem:[#allocation8 + $0x134] sm:$0xf0] }
 0x2a2   : > { %v2634_v30 = vor.u32 %v2949_v25, %v2631_v27  ;;  %v2669_v25 = vld [vmem:[#allocation8 + $0x68] sm:$0xf]  ;;  %v2960_v27 = vld [vmem:[#allocation8 + $0x74] sm:$0xf0]  ;;  %v2766_v35 = vor.u32 %v2984_v33, %v2765_v32 }
 0x2a3   : > { %2037 = vmatpush.bf16.msra.mxu1 %v2694_v23  ;;  %2081 = vmatpush.bf16.msrb.mxu0 %v2794_v45  ;;  %v2629_v23 = vld [vmem:[#allocation8 + $0x20] sm:$0xf]  ;;  %v2974_v45 = vld [vmem:[#allocation8 + $0xec] sm:$0xf] }
 0x2a4   : > { %v2630_v29 = vor.u32 %v2951_v1, %v2629_v23 }
 0x2a5   : > { %2053 = vmatpush.bf16.msra.mxu2 %v2790_v40  ;;  %2067 = vmatpush.bf16.msra.mxu3 %v2666_v48  ;;  %v2945_v40 = vld [vmem:[#allocation8 + $0x4] sm:$0xf]  ;;  %v2830_v48 = vor.u32 %v3000_v46, %v2829_v26  ;;  %v2751_v46 = vld [vmem:[#allocation8 + $0x118] sm:$0xf0] }
 0x2a6   : > { %v2618_v42 = vor.u32 %v2945_v40, %v2615_v41  ;;  %v2956_v40 = vld [vmem:[#allocation8 + $0x54] sm:$0xf0]  ;;  %v2954_v41 = vld [vmem:[#allocation8 + $0x4c] sm:$0xf] }
 0x2a7   : > { %2038 = vmatpush.bf16.msra.mxu1 %v2678_v37  ;;  %2082 = vmatpush.bf16.msrb.mxu0 %v2778_v56  ;;  %v2947_v37 = vld [vmem:[#allocation8 + $0xc] sm:$0xf0]  ;;  %v2719_v56 = vld [vmem:[#allocation8 + $0xd8] sm:$0xf0] }
 0x2a8   : > { %v2722_v57 = vor.u32 %v2970_v54, %v2719_v56  ;;  %v2621_v56 = vld [vmem:[#allocation8 + $0x8] sm:$0xf] }
 0x2a9   : > { %2054 = vmatpush.bf16.msra.mxu2 %v2774_v51  ;;  %2068 = vmatpush.bf16.msra.mxu3 %v2650_v0 }
 0x2ab   : > { %2039 = vmatpush.bf16.msra.mxu1 %v2662_v47  ;;  %2083 = vmatpush.bf16.msrb.mxu0 %v2762_v6  ;;  %v2738_v47 = vor.u32 %v2974_v45, %v2735_v24  ;;  %v2980_v45 = vld [vmem:[#allocation8 + $0x114] sm:$0xf0] }
 0x2ad   : > { %2055 = vmatpush.bf16.msra.mxu2 %v2758_v3  ;;  %2069 = vmatpush.bf16.msra.mxu3 %v2634_v30  ;;  %v2968_v3 = vld [vmem:[#allocation8 + $0xb4] sm:$0xf0]  ;;  %v2670_v30 = vor.u32 %v2960_v27, %v2669_v25 }
 0x2af   : > { %2040 = vmatpush.bf16.msra.mxu1 %v2646_v63  ;;  %2084 = vmatpush.bf16.msrb.mxu0 %v2746_v17  ;;  %v2815_v63 = vld [vmem:[#allocation8 + $0x198] sm:$0xf0]  ;;  %v2690_v17 = vor.u32 %v2962_v19, %v2687_v16 }
 0x2b0   : > { %v2818_v0 = vor.u32 %v2994_v59, %v2815_v63 }
 0x2b1   : > { %2056 = vmatpush.bf16.msra.mxu2 %v2742_v15  ;;  %2070 = vmatpush.bf16.msra.mxu3 %v2618_v42  ;;  %v2964_v15 = vld [vmem:[#allocation8 + $0x94] sm:$0xf0]  ;;  %v2655_v42 = vld [vmem:[#allocation8 + $0x58] sm:$0xf0] }
 0x2b2   : > { %v2686_v22 = vor.u32 %v2964_v15, %v2685_v14  ;;  %v2658_v24 = vor.u32 %v2954_v41, %v2655_v42 }
 0x2b3   : > { %2041 = vmatpush.bf16.msra.mxu1 %v2630_v29  ;;  %v2958_v29 = vld [vmem:[#allocation8 + $0x6c] sm:$0xf] }
 0x2b5   : > { %2105 = vmatpush.bf16.msrb.mxu2 %v2862_v28  ;;  %v2781_v28 = vld [vmem:[#allocation8 + $0x148] sm:$0xf] }
 0x2b9   : > { %2106 = vmatpush.bf16.msrb.mxu2 %v2846_v34  ;;  %v2674_v34 = vor.u32 %v2958_v29, %v2671_v31 }
 0x2bd   : > { %2107 = vmatpush.bf16.msrb.mxu2 %v2830_v48  ;;  %v2952_v48 = vld [vmem:[#allocation8 + $0x34] sm:$0xf0] }
 0x315   : > { %v1471_v21 = vpop.f32.mrf.mxu1 }
 0x316   : > { %v1472_v49 = vadd.f32 %v3169_v36, %v1471_v21  ;;  %v2863_v21 = vld [vmem:[#allocation8 + $0x1f8] sm:$0xf0] }
 0x317   : > { %v2866_v9 = vor.u32 %v3006_v18, %v2863_v21  ;;  %v2988_v18 = vld [vmem:[#allocation8 + $0x154] sm:$0xf0]  ;;  %v2986_v21 = vld [vmem:[#allocation8 + $0x14c] sm:$0xf] }
 0x318   : > { %v2782_v23 = vor.u32 %v2988_v18, %v2781_v28 }
 0x31d   : > { %v1473_v55 = vpop.f32.mrf.mxu1 }
 0x31e   : > { %v1474_v2 = vadd.f32 %v3169_v36, %v1473_v55  ;;  %v2613_v36 = vld [vmem:[#allocation8] sm:$0xf]  ;;  %v2718_v55 = vor.u32 %v2972_v53, %v2717_v52 }
 0x31f   : > { %v1485_v44 = vpop.f32.mrf.mxu2  ;;  %v2614_v38 = vor.u32 %v2947_v37, %v2613_v36  ;;  %v2982_v36 = vld [vmem:[#allocation8 + $0x12c] sm:$0xf]  ;;  %v2767_v37 = vld [vmem:[#allocation8 + $0x138] sm:$0xf0]  ;;  %v1513_v53 = vld [vmem:[%s3896_s8] sm:$0x3] }
 0x320   : > { %v1486_v60 = vadd.f32 %v1485_v44, %v1472_v49  ;;  %v2976_v44 = vld [vmem:[#allocation8 + $0xf4] sm:$0xf0]  ;;  %v2831_v49 = vld [vmem:[#allocation8 + $0x1b8] sm:$0xf0] }
 0x321   : > { %v2734_v20 = vor.u32 %v2976_v44, %v2733_v43  ;;  %2042 = vmatpush.bf16.msra.mxu1 %v2614_v38  ;;  %v2834_v51 = vor.u32 %v2998_v50, %v2831_v49  ;;  %v2770_v38 = vor.u32 %v2982_v36, %v2767_v37  ;;  %v2749_v44 = vld [vmem:[#allocation8 + $0x108] sm:$0xf]  ;;  %v2950_v49 = vld [vmem:[#allocation8 + $0x2c] sm:$0xf] }
 0x322   : > { %v1492_v7 = vmul.f32 0.2, %v1486_v60  ;;  %vm1490_vm0 = vcmp.gt.f32.partialorder %v1486_v60, 0.0  ;;  %v2750_v26 = vor.u32 %v2980_v45, %v2749_v44 }
 0x324   : > { %v1494_v11 = vsel %vm1490_vm0, %v1486_v60, %v1492_v7  ;;  %v2996_v60 = vld [vmem:[#allocation8 + $0x194] sm:$0xf0]  ;;  %v2703_v7 = vld [vmem:[#allocation8 + $0xb8] sm:$0xf0] }
 0x325   : > { %2091 = vmatpush.bf16.msrb.mxu1 %v2734_v20  ;;  %v2814_v61 = vor.u32 %v2996_v60, %v2813_v58  ;;  %v2978_v20 = vld [vmem:[#allocation8 + $0x10c] sm:$0xf]  ;;  %v1516_v60 = vperm.slane %v1513_v53, 1 }
 0x326   : > { %v2754_v50 = vor.u32 %v2978_v20, %v2751_v46  ;;  %v2946_v58 = vld [vmem:[#allocation8 + $0xc] sm:$0xf] }
 0x327   : > { %v1487_v5 = vpop.f32.mrf.mxu2  ;;  %2108 = vmatpush.bf16.msrb.mxu2 %v2814_v61  ;;  %v2623_v61 = vld [vmem:[#allocation8 + $0x18] sm:$0xf0] }
 0x328   : > { %v1488_v8 = vadd.f32 %v1487_v5, %v1474_v2  ;;  %v2701_v2 = vld [vmem:[#allocation8 + $0xa8] sm:$0xf]  ;;  %v2966_v5 = vld [vmem:[#allocation8 + $0xac] sm:$0xf]  ;;  %v2626_v63 = vor.u32 %v2946_v58, %v2623_v61 }
 0x329   : > { %2092 = vmatpush.bf16.msrb.mxu1 %v2718_v55  ;;  %v2702_v6 = vor.u32 %v2968_v3, %v2701_v2  ;;  %v1515_v3 = vperm.slane %v1513_v53, 0 }
 0x32a   : > { %vm1491_vm3 = vcmp.gt.f32.partialorder %v1488_v8, 0.0  ;;  %v1493_v10 = vmul.f32 0.2, %v1488_v8 }
 0x32c   : > { %v1495_v12 = vsel %vm1491_vm3, %v1488_v8, %v1493_v10  ;;  %v2706_v8 = vor.u32 %v2966_v5, %v2703_v7  ;;  %v2797_v10 = vld [vmem:[#allocation8 + $0x168] sm:$0xf] }
 0x32d   : > { %v1496_v13 = vpack.c.bf16 %v1495_v12, %v1494_v11  ;;  %v2992_v11 = vld [vmem:[#allocation8 + $0x174] sm:$0xf0]  ;;  %v2990_v12 = vld [vmem:[#allocation8 + $0x16c] sm:$0xf]  ;;  %2093 = vmatpush.bf16.msrb.mxu1 %v2702_v6 }
 0x32e   : > { %v2802_v62 = vor.u32 %v2990_v12, %v2799_v4 }
 0x32f   : > { %1607 = vmatmul.bf16.vlgmr.msrb.gmra.mxu3 %v1496_v13  ;;  %1621 = vmatmul.bf16.vlgmr.msra.gmra.mxu0 %v1496_v13  ;;  %v2798_v13 = vor.u32 %v2992_v11, %v2797_v10 }
 0x330   : > { %2133 = vmatpush.bf16.msra.mxu0 %v2866_v9  ;;  %2119 = vmatpush.bf16.msrb.mxu3 %v2738_v47  ;;  %v2783_v9 = vld [vmem:[#allocation8 + $0x158] sm:$0xf0]  ;;  %v2637_v47 = vld [vmem:[#allocation8 + $0x28] sm:$0xf] }
 0x331   : > { %2109 = vmatpush.bf16.msrb.mxu2 %v2798_v13  ;;  %2094 = vmatpush.bf16.msrb.mxu1 %v2686_v22  ;;  %v2786_v1 = vor.u32 %v2986_v21, %v2783_v9  ;;  %v2638_v52 = vor.u32 %v2952_v48, %v2637_v47 }
 0x334   : > { %2134 = vmatpush.bf16.msra.mxu0 %v2850_v39  ;;  %2120 = vmatpush.bf16.msrb.mxu3 %v2722_v57  ;;  %v2653_v39 = vld [vmem:[#allocation8 + $0x48] sm:$0xf]  ;;  %v2948_v57 = vld [vmem:[#allocation8 + $0x14] sm:$0xf0] }
 0x335   : > { %2110 = vmatpush.bf16.msrb.mxu2 %v2782_v23  ;;  %2095 = vmatpush.bf16.msrb.mxu1 %v2670_v30  ;;  %v2654_v43 = vor.u32 %v2956_v40, %v2653_v39  ;;  %v2622_v59 = vor.u32 %v2948_v57, %v2621_v56 }
 0x338   : > { %2135 = vmatpush.bf16.msra.mxu0 %v2834_v51  ;;  %2121 = vmatpush.bf16.msrb.mxu3 %v2706_v8  ;;  %v2639_v51 = vld [vmem:[#allocation8 + $0x38] sm:$0xf0] }
 0x339   : > { %2111 = vmatpush.bf16.msrb.mxu2 %v2766_v35  ;;  %2096 = vmatpush.bf16.msrb.mxu1 %v2654_v43  ;;  %v2642_v54 = vor.u32 %v2950_v49, %v2639_v51 }
 0x33c   : > { %2136 = vmatpush.bf16.msra.mxu0 %v2818_v0  ;;  %2122 = vmatpush.bf16.msrb.mxu3 %v2690_v17  ;;  %v3834_v17 = vld [vmem:[%s3898_s10] sm:$0xf] }
 0x33d   : > { %2112 = vmatpush.bf16.msrb.mxu2 %v2750_v26  ;;  %2097 = vmatpush.bf16.msrb.mxu1 %v2638_v52  ;;  %v1707_v28 = vperm.slane %v3834_v17, 0  ;;  %v1708_v25 = vperm.slane %v3834_v17, 1  ;;  %v1709_v41 = vperm.slane %v3834_v17, 2  ;;  %v1710_v48 = vperm.slane %v3834_v17, 3 }
 0x340   : > { %2137 = vmatpush.bf16.msra.mxu0 %v2802_v62  ;;  %2123 = vmatpush.bf16.msrb.mxu3 %v2674_v34 }
 0x341   : > { %2098 = vmatpush.bf16.msrb.mxu1 %v2622_v59 }
 0x344   : > { %2138 = vmatpush.bf16.msra.mxu0 %v2786_v1  ;;  %2124 = vmatpush.bf16.msrb.mxu3 %v2658_v24 }
 0x348   : > { %2139 = vmatpush.bf16.msra.mxu0 %v2770_v38  ;;  %2125 = vmatpush.bf16.msrb.mxu3 %v2642_v54 }
 0x34c   : > { %2140 = vmatpush.bf16.msra.mxu0 %v2754_v50  ;;  %2126 = vmatpush.bf16.msrb.mxu3 %v2626_v63 }
 0x3ac   : > { %v1622_v55 = vpop.f32.mrf.mxu0 }
 0x3ad   : > { %v1623_v0 = vadd.f32 %v1622_v55, %v1516_v60 }
 0x3af   : > { %v1632_v6 = vmul.f32 0.2, %v1623_v0  ;;  %vm1628_vm5 = vcmp.gt.f32.partialorder %v1623_v0, 0.0 }
 0x3b1   : > { %v1636_v11 = vsel %vm1628_vm5, %v1623_v0, %v1632_v6 }
 0x3b2   : > { %v1608_v2 = vpop.f32.mrf.mxu3 }
 0x3b3   : > { %v1609_v8 = vadd.f32 %v1608_v2, %v1515_v3 }
 0x3b4   : > { %v1624_v5 = vpop.f32.mrf.mxu0 }
 0x3b5   : > { %v1625_v7 = vadd.f32 %v1624_v5, %v1516_v60  ;;  %v1631_v62 = vmul.f32 0.2, %v1609_v8  ;;  %vm1627_vm7 = vcmp.gt.f32.partialorder %v1609_v8, 0.0 }
 0x3b7   : > { %vm1630_vm4 = vcmp.gt.f32.partialorder %v1625_v7, 0.0  ;;  %v1634_v10 = vmul.f32 0.2, %v1625_v7  ;;  %v1635_v19 = vsel %vm1627_vm7, %v1609_v8, %v1631_v62 }
 0x3b9   : > { %v1638_v12 = vsel %vm1630_vm4, %v1625_v7, %v1634_v10 }
 0x3ba   : > { %v1640_v13 = vpack.c.bf16 %v1638_v12, %v1636_v11  ;;  %v1610_v4 = vpop.f32.mrf.mxu3 }
 0x3bb   : > { %v1611_v14 = vadd.f32 %v1610_v4, %v1515_v3 }
 0x3bc   : > { %2057 = vmatmul.bf16.vlgmr.msra.gmra.mxu2 %v1640_v13  ;;  %2085 = vmatmul.bf16.vlgmr.msrb.gmra.mxu0 %v1640_v13 }
 0x3bd   : > { %vm1629_vm8 = vcmp.gt.f32.partialorder %v1611_v14, 0.0  ;;  %v1633_v15 = vmul.f32 0.2, %v1611_v14 }
 0x3bf   : > { %v1637_v22 = vsel %vm1629_vm8, %v1611_v14, %v1633_v15 }
 0x3c0   : > { %v1639_v16 = vpack.c.bf16 %v1637_v22, %v1635_v19 }
 0x3c2   : > { %2043 = vmatmul.bf16.vlgmr.msra.gmra.mxu1 %v1639_v16  ;;  %2071 = vmatmul.bf16.vlgmr.msra.gmra.mxu3 %v1639_v16 }
 0x3cc   : > { %2113 = vmatmul.bf16.vlgmr.msrb.gmra.mxu2 %v1640_v13  ;;  %2141 = vmatmul.bf16.vlgmr.msra.gmra.mxu0 %v1640_v13 }
 0x3d2   : > { %2099 = vmatmul.bf16.vlgmr.msrb.gmra.mxu1 %v1639_v16  ;;  %2127 = vmatmul.bf16.vlgmr.msrb.gmra.mxu3 %v1639_v16 }
 0x439   : > { %v2086_v9 = vpop.f32.mrf.mxu0 }
 0x43f   : > { %v2044_v18 = vpop.f32.mrf.mxu1  ;;  %v2058_v21 = vpop.f32.mrf.mxu2 }
 0x440   : > { %v2045_v23 = vadd.f32 %v2044_v18, %v1707_v28 }
 0x441   : > { %v2088_v39 = vpop.f32.mrf.mxu0 }
 0x442   : > { %v2059_v1 = vadd.f32 %v2058_v21, %v2045_v23 }
 0x444   : > { %vm2147_vm9 = vcmp.gt.f32.partialorder %v2059_v1, 0.0  ;;  %v2155_v27 = vmul.f32 0.2, %v2059_v1 }
 0x445   : > { %v2072_v29 = vpop.f32.mrf.mxu3 }
 0x446   : > { %v2163_v30 = vsel %vm2147_vm9, %v2059_v1, %v2155_v27  ;;  %v2073_v31 = vadd.f32 %v2072_v29, %v1708_v25 }
 0x447   : > { %2171 = vst [vmem:[%s3841_s26] sm:$0xff] %v2163_v30  ;;  %v2046_v32 = vpop.f32.mrf.mxu1  ;;  %v2060_v33 = vpop.f32.mrf.mxu2 }
 0x448   : > { %v2087_v34 = vadd.f32 %v2086_v9, %v2073_v31  ;;  %v2047_v35 = vadd.f32 %v2046_v32, %v1707_v28 }
 0x449   : > { %v2142_v51 = vpop.f32.mrf.mxu0 }
 0x44a   : > { %vm2148_vm10 = vcmp.gt.f32.partialorder %v2087_v34, 0.0  ;;  %v2156_v36 = vmul.f32 0.2, %v2087_v34  ;;  %v2061_v37 = vadd.f32 %v2060_v33, %v2047_v35 }
 0x44c   : > { %v2164_v38 = vsel %vm2148_vm10, %v2087_v34, %v2156_v36  ;;  %vm2151_vm11 = vcmp.gt.f32.partialorder %v2061_v37, 0.0  ;;  %v2159_v40 = vmul.f32 0.2, %v2061_v37 }
 0x44d   : > { %2172 = vst [vmem:[%s3841_s26 + $0x8] sm:$0xff] %v2164_v38  ;;  %v2074_v42 = vpop.f32.mrf.mxu3 }
 0x44e   : > { %v2167_v43 = vsel %vm2151_vm11, %v2061_v37, %v2159_v40  ;;  %v2075_v44 = vadd.f32 %v2074_v42, %v1708_v25 }
 0x44f   : > { %2175 = vst [vmem:[%s3841_s26 + $0x20] sm:$0xff] %v2167_v43  ;;  %v2100_v45 = vpop.f32.mrf.mxu1  ;;  %v2114_v20 = vpop.f32.mrf.mxu2 }
 0x450   : > { %v2089_v24 = vadd.f32 %v2088_v39, %v2075_v44  ;;  %v2101_v26 = vadd.f32 %v2100_v45, %v1709_v41 }
 0x451   : > { %v2144_v5 = vpop.f32.mrf.mxu0 }
 0x452   : > { %vm2152_vm6 = vcmp.gt.f32.partialorder %v2089_v24, 0.0  ;;  %v2160_v46 = vmul.f32 0.2, %v2089_v24  ;;  %v2115_v47 = vadd.f32 %v2114_v20, %v2101_v26 }
 0x454   : > { %v2168_v50 = vsel %vm2152_vm6, %v2089_v24, %v2160_v46  ;;  %vm2149_vm12 = vcmp.gt.f32.partialorder %v2115_v47, 0.0  ;;  %v2157_v49 = vmul.f32 0.2, %v2115_v47 }
 0x455   : > { %2176 = vst [vmem:[%s3841_s26 + $0x28] sm:$0xff] %v2168_v50  ;;  %v2128_v52 = vpop.f32.mrf.mxu3 }
 0x456   : > { %v2165_v53 = vsel %vm2149_vm12, %v2115_v47, %v2157_v49  ;;  %v2129_v54 = vadd.f32 %v2128_v52, %v1710_v48 }
 0x457   : > { %2173 = vst [vmem:[%s3841_s26 + $0x10] sm:$0xff] %v2165_v53  ;;  %v2102_v55 = vpop.f32.mrf.mxu1  ;;  %v2116_v58 = vpop.f32.mrf.mxu2 }
 0x458   : > { %v2143_v56 = vadd.f32 %v2142_v51, %v2129_v54  ;;  %v2103_v57 = vadd.f32 %v2102_v55, %v1709_v41 }
 0x45a   : > { %vm2150_vm13 = vcmp.gt.f32.partialorder %v2143_v56, 0.0  ;;  %v2158_v60 = vmul.f32 0.2, %v2143_v56  ;;  %v2117_v59 = vadd.f32 %v2116_v58, %v2103_v57 }
 0x45c   : > { %v2166_v61 = vsel %vm2150_vm13, %v2143_v56, %v2158_v60  ;;  %vm2153_vm14 = vcmp.gt.f32.partialorder %v2117_v59, 0.0  ;;  %v2161_v63 = vmul.f32 0.2, %v2117_v59 }
 0x45d   : > { %2174 = vst [vmem:[%s3841_s26 + $0x18] sm:$0xff] %v2166_v61  ;;  %v2130_v0 = vpop.f32.mrf.mxu3 }
 0x45e   : > { %v2169_v2 = vsel %vm2153_vm14, %v2117_v59, %v2161_v63  ;;  %v2131_v3 = vadd.f32 %v2130_v0, %v1710_v48 }
 0x45f   : > { %2177 = vst [vmem:[%s3841_s26 + $0x30] sm:$0xff] %v2169_v2 }
 0x460   : > { %v2145_v6 = vadd.f32 %v2144_v5, %v2131_v3 }
 0x462   : > { %vm2154_vm15 = vcmp.gt.f32.partialorder %v2145_v6, 0.0  ;;  %v2162_v7 = vmul.f32 0.2, %v2145_v6 }
 0x464   : > { %v2170_v8 = vsel %vm2154_vm15, %v2145_v6, %v2162_v7 }
 0x465   : > { %2178 = vst [vmem:[%s3841_s26 + $0x38] sm:$0xff] %v2170_v8 }
 0x466   : > { %3257 = shalt.err (!%p3254_p8)
}
 0x467   : > { %s3312_s30 = smov 512  }
 0x468   : > { %3066 = dma.vmem_to_hbm [thread:$0]  (%p3411_p5), %s2194_s15, 1024, %s2196_s16, %s2180_s21, %s3312_s30, %s3312_s30, %s3309_s25  }
 0x469 PF: > { %p3083_p9 = scmp.ge.s32.totalorder %s3300_s20, 2  ;;  %s2210_s26 = sand.u32 1, %s3288_s17  }
 0x46a   : > { %s2211_s29 = scalar_lea.sflag [#allocation7], %s2210_s26 }
 0x46b   : > { %p3076_p10 = pnand %p3083_p9, %p3415_p6 }
 0x46d   : > { %p3077_p11 = pneg %p3076_p10 }
 0x46f   : > { %3283 = dma.done.wait (%p3077_p11), %s2211_s29, 1024  }
 0x470   : > { %3285 = vsyncadd (%p3077_p11), %s2211_s29, 4294966272  ;;  %s3914_s22 = sld [smem:[#allocation14_spill]]  ;;  %p23_p12 = scmp.ge.s32.totalorder %s3398_s23, 5  }
 0x471   : > { %s3915_s19 = sld [smem:[#allocation15_spill]]  ;;  %s3916_s17 = smov %s3292_s18 }
 0x472   : > { %s3918_s20 = smov %s3398_s23  ;;  %25 = sbr.rel (!%p23_p12) target bundleno = 7 (0x7), region = 133 }
 0x476   : > { %s3917_s18 = smov %s3914_s22 }
 0x477   :  { %2217 = vsyncpa [#allocation6], 1 }
 0x478   :  { %2219 = vsyncpa [#allocation6 + $0x1], 1 }
 0x479   :  { %2220 = vsyncpa [#allocation9], 1 }
 0x47a   :  { %2221 = vsyncpa [#allocation7], 1 }
 0x47b   :  { %2223 = vsyncpa [#allocation7 + $0x1], 1 }

</bundles_post_ra>
